<compile_context>
chip_gen: v5e
topology: v5e:2x2
jax: 0.10.0
libtpu: 0.0.40
codegen_flags: <defaults>
</compile_context>

<pallas_src>
import functools

import jax
import jax.numpy as jnp
import numpy as np
from jax.experimental import pallas as pl
from jax.experimental.pallas import tpu as pltpu


# --------------------------------------------------------------------------
# kernel
# --------------------------------------------------------------------------
def _block_kernel(x_ref, ln1w_ref, ln1b_ref, ln2w_ref, ln2b_ref,
                  wqkv_ref, wproj_ref, w0_ref, w1_ref,
                  out_ref, *, num_heads, head_size, compute_dtype):
    """One grid step: the full transformer block for Bt batch elements."""
    Bt, T, C = x_ref.shape
    H, hs = num_heads, head_size
    R = Bt * T
    eps = 1e-5                      # torch.nn.functional.layer_norm default
    cd = compute_dtype

    x = x_ref[...]                  # [Bt, T, C] f32
    x2d = x.reshape(R, C)           # flatten batch*seq rows for LN / matmuls

    def layer_norm(h, w, b):
        # one-pass stats: mean and E[h^2] (independent reductions), biased var
        mu = jnp.mean(h, axis=-1, keepdims=True)
        ms = jnp.mean(h * h, axis=-1, keepdims=True)
        var = ms - mu * mu
        return (h - mu) * jax.lax.rsqrt(var + eps) * w + b

    # ---- 1) x = x + Proj(MultiHeadAttention(LN1(x))) ----------------------
    h1 = layer_norm(x2d, ln1w_ref[0], ln1b_ref[0]).astype(cd)       # [R, C]

    # fused QKV projection: one MXU matmul for all heads' q, k and v
    # (1/sqrt(hs) attention scale already folded into the q columns on host)
    qkv = jnp.dot(h1, wqkv_ref[...],
                  preferred_element_type=jnp.float32)               # [R, 3C]
    q3 = qkv[:, 0 * C:1 * C].reshape(Bt, T, C)
    k3 = qkv[:, 1 * C:2 * C].reshape(Bt, T, C)
    v3 = qkv[:, 2 * C:3 * C].reshape(Bt, T, C)

    # causal mask built once per grid step (not per head)
    row = jax.lax.broadcasted_iota(jnp.int32, (T, T), 0)
    col = jax.lax.broadcasted_iota(jnp.int32, (T, T), 1)
    causal = (row >= col)[None, :, :]                               # [1, T, T]

    sa3 = None
    for h in range(H):
        lo, hi = h * hs, (h + 1) * hs
        qh = q3[:, :, lo:hi].astype(cd)                             # [Bt,T,hs]
        kh = k3[:, :, lo:hi].astype(cd)
        vh = v3[:, :, lo:hi].astype(cd)

        s = jnp.einsum('btd,bsd->bts', qh, kh,
                       preferred_element_type=jnp.float32)          # [Bt,T,T]
        s = jnp.where(causal, s, -jnp.inf)
        m = jnp.max(s, axis=-1, keepdims=True)
        p = jnp.exp(s - m)
        l = jnp.sum(p, axis=-1, keepdims=True)                      # [Bt,T,1]

        ctx = jnp.einsum('bts,bsd->btd', p.astype(cd), vh,
                         preferred_element_type=jnp.float32)        # [Bt,T,hs]
        # normalize AFTER p@v (T*hs values, not T*T) on the EUP slot
        ctx = ctx * pl.reciprocal(l, approx=True)

        # fold this head's slice of the output projection in directly
        # (avoids concatenating 8-lane-wide head outputs + a .T projection)
        contrib = jnp.einsum('btd,dc->btc', ctx.astype(cd), wproj_ref[h],
                             preferred_element_type=jnp.float32)    # [Bt,T,C]
        sa3 = contrib if sa3 is None else sa3 + contrib

    x1 = x2d + sa3.reshape(R, C)                                    # residual

    # ---- 2) x = x + FeedForward(LN2(x)) ------------------------------------
    h2 = layer_norm(x1, ln2w_ref[0], ln2b_ref[0]).astype(cd)        # [R, C]
    hid = jnp.dot(h2, w0_ref[...], preferred_element_type=jnp.float32)   # [R,4C]
    hid = jnp.maximum(hid, 0.0)     # activation_id = 0 -> ReLU
    ff = jnp.dot(hid.astype(cd), w1_ref[...],
                 preferred_element_type=jnp.float32)                # [R, C]

    out_ref[...] = (x1 + ff).reshape(Bt, T, C).astype(out_ref.dtype)


# --------------------------------------------------------------------------
# host-side weight preparation (one-time transposes / stacking / casting)
# --------------------------------------------------------------------------
def prepare_params(raw, *, num_heads, head_size, compute_dtype):
    H, hs = num_heads, head_size
    C = raw["wproj"].shape[0]
    wd = compute_dtype
    scale = jnp.float32(hs) ** -0.5
    # torch nn.Linear weights are [out, in]; transpose once on host.
    wq_t = jnp.transpose(raw["wq"].reshape(H * hs, C)) * scale      # [C, H*hs]
    wk_t = jnp.transpose(raw["wk"].reshape(H * hs, C))
    wv_t = jnp.transpose(raw["wv"].reshape(H * hs, C))
    wqkv = jnp.concatenate([wq_t, wk_t, wv_t], axis=1).astype(wd)   # [C, 3C]
    wproj_t = jnp.transpose(raw["wproj"]).reshape(H, hs, C).astype(wd)  # [H,hs,C]
    w0_t = jnp.transpose(raw["w0"]).astype(wd)                      # [C, 4C]
    w1_t = jnp.transpose(raw["w1"]).astype(wd)                      # [4C, C]
    ln = lambda a: a.reshape(1, C).astype(jnp.float32)
    return dict(ln1_w=ln(raw["ln1_w"]), ln1_b=ln(raw["ln1_b"]),
                ln2_w=ln(raw["ln2_w"]), ln2_b=ln(raw["ln2_b"]),
                wqkv=wqkv, wproj_t=wproj_t, w0_t=w0_t, w1_t=w1_t)


def _default_batch_block(B, T, C, itemsize=4, max_bytes=2 << 20):
    """Largest batch block that keeps >=2 grid steps (megacore) and fits budget."""
    best = 1
    for bt in range(1, B + 1):
        if B % bt:
            continue
        if B >= 2 and B // bt < 2:
            continue
        if bt * T * C * itemsize > max_bytes:
            continue
        best = max(best, bt)
    return best


# --------------------------------------------------------------------------
# wrapper
# --------------------------------------------------------------------------
def block_forward(x, raw_params, *, num_heads, head_size,
                  compute_dtype=jnp.float32, batch_block=None):
    x = x.astype(jnp.float32)
    B, T, C = x.shape
    H, hs = num_heads, head_size
    assert H * hs == C, "num_heads * head_size must equal n_embd"

    Bt = batch_block if batch_block is not None else _default_batch_block(B, T, C)
    assert B % Bt == 0

    p = prepare_params(raw_params, num_heads=H, head_size=hs,
                       compute_dtype=compute_dtype)
    kernel = functools.partial(_block_kernel, num_heads=H, head_size=hs,
                               compute_dtype=compute_dtype)

    const2 = lambda shape: pl.BlockSpec(shape, lambda g: (0, 0))
    const3 = lambda shape: pl.BlockSpec(shape, lambda g: (0, 0, 0))

    return pl.pallas_call(
        kernel,
        out_shape=jax.ShapeDtypeStruct((B, T, C), jnp.float32),
        grid_spec=pltpu.PrefetchScalarGridSpec(
            num_scalar_prefetch=0,
            grid=(B // Bt,),
            in_specs=[
                pl.BlockSpec((Bt, T, C), lambda g: (g, 0, 0)),   # x
                const2((1, C)), const2((1, C)),                  # ln1 w / b
                const2((1, C)), const2((1, C)),                  # ln2 w / b
                const2((C, 3 * C)),                              # fused Wqkv^T
                const3((H, hs, C)),                              # Wproj^T per head
                const2((C, 4 * C)),                              # FFN W0^T
                const2((4 * C, C)),                              # FFN W1^T
            ],
            out_specs=pl.BlockSpec((Bt, T, C), lambda g: (g, 0, 0)),
        ),
        compiler_params=pltpu.CompilerParams(
            dimension_semantics=("parallel",),
            vmem_limit_bytes=32 * 1024 * 1024),
    )(x, p["ln1_w"], p["ln1_b"], p["ln2_w"], p["ln2_b"],
      p["wqkv"], p["wproj_t"], p["w0_t"], p["w1_t"])


# --------------------------------------------------------------------------
# pure-JAX reference (mirrors the PyTorch module exactly, f32 throughout)
# --------------------------------------------------------------------------
def block_reference(x, raw, *, num_heads, head_size):
    eps = 1e-5

    def layer_norm(h, w, b):
        mu = jnp.mean(h, axis=-1, keepdims=True)
        var = jnp.mean((h - mu) ** 2, axis=-1, keepdims=True)
        return (h - mu) * jax.lax.rsqrt(var + eps) * w + b

    B, T, C = x.shape
    h1 = layer_norm(x, raw["ln1_w"], raw["ln1_b"])
    causal = jnp.tril(jnp.ones((T, T), dtype=bool))
    outs = []
    for h in range(num_heads):
        k = h1 @ raw["wk"][h].T
        q = h1 @ raw["wq"][h].T
        v = h1 @ raw["wv"][h].T
        wei = (q @ jnp.swapaxes(k, -2, -1)) * head_size ** (-0.5)
        wei = jnp.where(causal, wei, -jnp.inf)
        wei = jax.nn.softmax(wei, axis=-1)
        outs.append(wei @ v)
    sa = jnp.concatenate(outs, axis=-1) @ raw["wproj"].T
    x1 = x + sa
    h2 = layer_norm(x1, raw["ln2_w"], raw["ln2_b"])
    ff = jnp.maximum(h2 @ raw["w0"].T, 0.0) @ raw["w1"].T
    return x1 + ff


if __name__ == "__main__":
    # small shapes consistent with the module (seq <= block_size=64)
    B, T, C = 4, 16, 32            # batch, sequence, n_embd
    num_heads, head_size = 4, 8    # num_heads * head_size == n_embd

    key = jax.random.PRNGKey(0)
    ks = jax.random.split(key, 8)
    init = lambda k, shape: (0.02 * jax.random.normal(k, shape)).astype(jnp.float32)

    raw_params = {
        "ln1_w": jnp.ones((C,), jnp.float32),
        "ln1_b": jnp.zeros((C,), jnp.float32),
        "ln2_w": jnp.ones((C,), jnp.float32),
        "ln2_b": jnp.zeros((C,), jnp.float32),
        "wq": init(ks[0], (num_heads, head_size, C)),   # torch nn.Linear layout [out,in]
        "wk": init(ks[1], (num_heads, head_size, C)),
        "wv": init(ks[2], (num_heads, head_size, C)),
        "wproj": init(ks[3], (C, C)),
        "w0": init(ks[4], (4 * C, C)),
        "w1": init(ks[5], (C, 4 * C)),
    }
    x = jax.random.normal(ks[6], (B, T, C), dtype=jnp.float32)

    ref = block_reference(x, raw_params, num_heads=num_heads, head_size=head_size)

    # f32 MXU path (tolerance covers the EUP approx-reciprocal softmax)
    out_f32 = block_forward(x, raw_params, num_heads=num_heads,
                            head_size=head_size, compute_dtype=jnp.float32)
    out_f32 = jax.block_until_ready(out_f32)
    np.testing.assert_allclose(np.asarray(out_f32), np.asarray(ref),
                               rtol=2e-3, atol=2e-3)

    # bf16 MXU operands with f32 accumulation (v6e / v7x throughput lever)
    out_bf16 = block_forward(x, raw_params, num_heads=num_heads,
                             head_size=head_size, compute_dtype=jnp.bfloat16)
    out_bf16 = jax.block_until_ready(out_bf16)
    np.testing.assert_allclose(np.asarray(out_bf16), np.asarray(ref),
                               rtol=2e-2, atol=2e-2)

    print("KERNEL_OK")
</pallas_src>

<mosaic_0001>
module attributes {stable_mosaic.version = 11 : i64} {
  func.func @_block_kernel(%arg0: i32, %arg1: memref<2x16x32xf32, #tpu.memory_space<vmem>>, %arg2: memref<1x32xf32, #tpu.memory_space<vmem>>, %arg3: memref<1x32xf32, #tpu.memory_space<vmem>>, %arg4: memref<1x32xf32, #tpu.memory_space<vmem>>, %arg5: memref<1x32xf32, #tpu.memory_space<vmem>>, %arg6: memref<32x96xf32, #tpu.memory_space<vmem>>, %arg7: memref<4x8x32xf32, #tpu.memory_space<vmem>>, %arg8: memref<32x128xf32, #tpu.memory_space<vmem>>, %arg9: memref<128x32xf32, #tpu.memory_space<vmem>>, %arg10: memref<2x16x32xf32, #tpu.memory_space<vmem>>) attributes {dimension_semantics = [#tpu.dimension_semantics<parallel>], iteration_bounds = array<i64: 2>, scalar_prefetch = 0 : i64, scratch_operands = 0 : i64, tpu.core_type = #tpu.core_type<tc>, window_params = [{transform_indices = @transform_0, window_bounds = array<i64: 2, 16, 32>}, {pipeline_mode = #tpu.pipeline_mode<synchronous>, transform_indices = @transform_1, window_bounds = array<i64: 1, 32>}, {pipeline_mode = #tpu.pipeline_mode<synchronous>, transform_indices = @transform_2, window_bounds = array<i64: 1, 32>}, {pipeline_mode = #tpu.pipeline_mode<synchronous>, transform_indices = @transform_3, window_bounds = array<i64: 1, 32>}, {pipeline_mode = #tpu.pipeline_mode<synchronous>, transform_indices = @transform_4, window_bounds = array<i64: 1, 32>}, {pipeline_mode = #tpu.pipeline_mode<synchronous>, transform_indices = @transform_5, window_bounds = array<i64: 32, 96>}, {pipeline_mode = #tpu.pipeline_mode<synchronous>, transform_indices = @transform_6, window_bounds = array<i64: 4, 8, 32>}, {pipeline_mode = #tpu.pipeline_mode<synchronous>, transform_indices = @transform_7, window_bounds = array<i64: 32, 128>}, {pipeline_mode = #tpu.pipeline_mode<synchronous>, transform_indices = @transform_8, window_bounds = array<i64: 128, 32>}, {transform_indices = @transform_9, window_bounds = array<i64: 2, 16, 32>}]} {
    %c0 = arith.constant 0 : index
    %c0_0 = arith.constant 0 : index
    %c0_1 = arith.constant 0 : index
    %0 = vector.load %arg1[%c0, %c0_0, %c0_1] : memref<2x16x32xf32, #tpu.memory_space<vmem>>, vector<2x16x32xf32>
    %1 = vector.shape_cast %0 : vector<2x16x32xf32> to vector<32x32xf32>
    %c0_2 = arith.constant 0 : index
    %c0_3 = arith.constant 0 : index
    %2 = vector.load %arg2[%c0_2, %c0_3] : memref<1x32xf32, #tpu.memory_space<vmem>>, vector<1x32xf32>
    %3 = vector.shape_cast %2 : vector<1x32xf32> to vector<32xf32>
    %c0_4 = arith.constant 0 : index
    %c0_5 = arith.constant 0 : index
    %4 = vector.load %arg3[%c0_4, %c0_5] : memref<1x32xf32, #tpu.memory_space<vmem>>, vector<1x32xf32>
    %5 = vector.shape_cast %4 : vector<1x32xf32> to vector<32xf32>
    %cst = arith.constant dense<0.000000e+00> : vector<32xf32>
    %6 = vector.multi_reduction <add>, %1, %cst [1] : vector<32x32xf32> to vector<32xf32>
    %7 = vector.shape_cast %6 : vector<32xf32> to vector<32x1xf32>
    %cst_6 = arith.constant 3.200000e+01 : f32
    %8 = vector.broadcast %cst_6 : f32 to vector<32x1xf32>
    %9 = arith.divf %7, %8 : vector<32x1xf32>
    %10 = arith.mulf %1, %1 : vector<32x32xf32>
    %cst_7 = arith.constant dense<0.000000e+00> : vector<32xf32>
    %11 = vector.multi_reduction <add>, %10, %cst_7 [1] : vector<32x32xf32> to vector<32xf32>
    %12 = vector.shape_cast %11 : vector<32xf32> to vector<32x1xf32>
    %cst_8 = arith.constant 3.200000e+01 : f32
    %13 = vector.broadcast %cst_8 : f32 to vector<32x1xf32>
    %14 = arith.divf %12, %13 : vector<32x1xf32>
    %15 = arith.mulf %9, %9 : vector<32x1xf32>
    %16 = arith.subf %14, %15 : vector<32x1xf32>
    %17 = vector.broadcast %9 : vector<32x1xf32> to vector<32x32xf32>
    %18 = arith.subf %1, %17 : vector<32x32xf32>
    %cst_9 = arith.constant 9.99999974E-6 : f32
    %19 = vector.broadcast %cst_9 : f32 to vector<32x1xf32>
    %20 = arith.addf %16, %19 : vector<32x1xf32>
    %21 = math.rsqrt %20 : vector<32x1xf32>
    %22 = vector.broadcast %21 : vector<32x1xf32> to vector<32x32xf32>
    %23 = arith.mulf %18, %22 : vector<32x32xf32>
    %24 = vector.shape_cast %3 : vector<32xf32> to vector<1x32xf32>
    %25 = vector.broadcast %24 : vector<1x32xf32> to vector<32x32xf32>
    %26 = arith.mulf %23, %25 : vector<32x32xf32>
    %27 = vector.shape_cast %5 : vector<32xf32> to vector<1x32xf32>
    %28 = vector.broadcast %27 : vector<1x32xf32> to vector<32x32xf32>
    %29 = arith.addf %26, %28 : vector<32x32xf32>
    %c0_10 = arith.constant 0 : index
    %c0_11 = arith.constant 0 : index
    %30 = vector.load %arg6[%c0_10, %c0_11] : memref<32x96xf32, #tpu.memory_space<vmem>>, vector<32x96xf32>
    %cst_12 = arith.constant dense<0.000000e+00> : vector<32x96xf32>
    %31 = tpu.matmul %29, %30, %cst_12 {dimension_numbers = #tpu.dot_dimension_numbers<[1], [0], [0], [1], [0, 0, 1, 1], [], []>} : vector<32x32xf32>, vector<32x96xf32>, vector<32x96xf32> -> vector<32x96xf32>
    %32 = vector.extract_strided_slice %31 {offsets = [0, 0], sizes = [32, 32], strides = [1, 1]} : vector<32x96xf32> to vector<32x32xf32>
    %33 = vector.shape_cast %32 : vector<32x32xf32> to vector<2x16x32xf32>
    %34 = vector.extract_strided_slice %31 {offsets = [0, 32], sizes = [32, 32], strides = [1, 1]} : vector<32x96xf32> to vector<32x32xf32>
    %35 = vector.shape_cast %34 : vector<32x32xf32> to vector<2x16x32xf32>
    %36 = vector.extract_strided_slice %31 {offsets = [0, 64], sizes = [32, 32], strides = [1, 1]} : vector<32x96xf32> to vector<32x32xf32>
    %37 = vector.shape_cast %36 : vector<32x32xf32> to vector<2x16x32xf32>
    %38 = tpu.iota {dimensions = array<i32: 0>} : vector<16x16xi32>
    %39 = tpu.iota {dimensions = array<i32: 1>} : vector<16x16xi32>
    %40 = arith.cmpi sge, %38, %39 : vector<16x16xi32>
    %41 = vector.shape_cast %40 : vector<16x16xi1> to vector<1x16x16xi1>
    %42 = vector.extract_strided_slice %33 {offsets = [0, 0, 0], sizes = [2, 16, 8], strides = [1, 1, 1]} : vector<2x16x32xf32> to vector<2x16x8xf32>
    %43 = vector.extract_strided_slice %35 {offsets = [0, 0, 0], sizes = [2, 16, 8], strides = [1, 1, 1]} : vector<2x16x32xf32> to vector<2x16x8xf32>
    %44 = vector.extract_strided_slice %37 {offsets = [0, 0, 0], sizes = [2, 16, 8], strides = [1, 1, 1]} : vector<2x16x32xf32> to vector<2x16x8xf32>
    "tpu.trace_start"() <{level = 10 : i32, message = "btd,bsd->bts"}> : () -> ()
    %cst_13 = arith.constant dense<0.000000e+00> : vector<2x16x16xf32>
    %45 = tpu.matmul %42, %43, %cst_13 {dimension_numbers = #tpu.dot_dimension_numbers<[2], [2], [1], [1], [0, 0, 0, 1, 1, 1], [0], [0]>} : vector<2x16x8xf32>, vector<2x16x8xf32>, vector<2x16x16xf32> -> vector<2x16x16xf32>
    %cst_14 = arith.constant 0xFF800000 : f32
    "tpu.trace_stop"() : () -> ()
    %46 = vector.shape_cast %41 : vector<1x16x16xi1> to vector<1x16x16xi1>
    %47 = vector.broadcast %46 : vector<1x16x16xi1> to vector<2x16x16xi1>
    %48 = vector.broadcast %cst_14 : f32 to vector<2x16x16xf32>
    %49 = arith.select %47, %45, %48 : vector<2x16x16xi1>, vector<2x16x16xf32>
    %cst_15 = arith.constant dense<0xFF800000> : vector<2x16xf32>
    %50 = vector.multi_reduction <maximumf>, %49, %cst_15 [2] : vector<2x16x16xf32> to vector<2x16xf32>
    %51 = vector.shape_cast %50 : vector<2x16xf32> to vector<2x16x1xf32>
    %52 = vector.broadcast %51 : vector<2x16x1xf32> to vector<2x16x16xf32>
    %53 = arith.subf %49, %52 : vector<2x16x16xf32>
    %54 = math.exp %53 : vector<2x16x16xf32>
    %cst_16 = arith.constant dense<0.000000e+00> : vector<2x16xf32>
    %55 = vector.multi_reduction <add>, %54, %cst_16 [2] : vector<2x16x16xf32> to vector<2x16xf32>
    %56 = vector.shape_cast %55 : vector<2x16xf32> to vector<2x16x1xf32>
    "tpu.trace_start"() <{level = 10 : i32, message = "bts,bsd->btd"}> : () -> ()
    %cst_17 = arith.constant dense<0.000000e+00> : vector<2x16x8xf32>
    %57 = tpu.matmul %54, %44, %cst_17 {dimension_numbers = #tpu.dot_dimension_numbers<[2], [1], [1], [2], [0, 0, 0, 1, 1, 2], [0], [0]>} : vector<2x16x16xf32>, vector<2x16x8xf32>, vector<2x16x8xf32> -> vector<2x16x8xf32>
    "tpu.trace_stop"() : () -> ()
    %58 = tpu.reciprocal %56 {approx = true} : vector<2x16x1xf32> -> vector<2x16x1xf32>
    %59 = vector.broadcast %58 : vector<2x16x1xf32> to vector<2x16x8xf32>
    %60 = arith.mulf %57, %59 : vector<2x16x8xf32>
    %c0_18 = arith.constant 0 : index
    %c0_19 = arith.constant 0 : index
    %c0_20 = arith.constant 0 : index
    %61 = vector.load %arg7[%c0_18, %c0_19, %c0_20] : memref<4x8x32xf32, #tpu.memory_space<vmem>>, vector<1x8x32xf32>
    %62 = vector.shape_cast %61 : vector<1x8x32xf32> to vector<8x32xf32>
    "tpu.trace_start"() <{level = 10 : i32, message = "btd,dc->btc"}> : () -> ()
    %cst_21 = arith.constant dense<0.000000e+00> : vector<2x16x32xf32>
    %63 = tpu.matmul %60, %62, %cst_21 {dimension_numbers = #tpu.dot_dimension_numbers<[2], [0], [0, 1], [1], [0, 0, 0, 1, 1, 1], [], []>} : vector<2x16x8xf32>, vector<8x32xf32>, vector<2x16x32xf32> -> vector<2x16x32xf32>
    "tpu.trace_stop"() : () -> ()
    %64 = vector.extract_strided_slice %33 {offsets = [0, 0, 8], sizes = [2, 16, 8], strides = [1, 1, 1]} : vector<2x16x32xf32> to vector<2x16x8xf32>
    %65 = vector.extract_strided_slice %35 {offsets = [0, 0, 8], sizes = [2, 16, 8], strides = [1, 1, 1]} : vector<2x16x32xf32> to vector<2x16x8xf32>
    %66 = vector.extract_strided_slice %37 {offsets = [0, 0, 8], sizes = [2, 16, 8], strides = [1, 1, 1]} : vector<2x16x32xf32> to vector<2x16x8xf32>
    "tpu.trace_start"() <{level = 10 : i32, message = "btd,bsd->bts"}> : () -> ()
    %cst_22 = arith.constant dense<0.000000e+00> : vector<2x16x16xf32>
    %67 = tpu.matmul %64, %65, %cst_22 {dimension_numbers = #tpu.dot_dimension_numbers<[2], [2], [1], [1], [0, 0, 0, 1, 1, 1], [0], [0]>} : vector<2x16x8xf32>, vector<2x16x8xf32>, vector<2x16x16xf32> -> vector<2x16x16xf32>
    %cst_23 = arith.constant 0xFF800000 : f32
    "tpu.trace_stop"() : () -> ()
    %68 = vector.shape_cast %41 : vector<1x16x16xi1> to vector<1x16x16xi1>
    %69 = vector.broadcast %68 : vector<1x16x16xi1> to vector<2x16x16xi1>
    %70 = vector.broadcast %cst_23 : f32 to vector<2x16x16xf32>
    %71 = arith.select %69, %67, %70 : vector<2x16x16xi1>, vector<2x16x16xf32>
    %cst_24 = arith.constant dense<0xFF800000> : vector<2x16xf32>
    %72 = vector.multi_reduction <maximumf>, %71, %cst_24 [2] : vector<2x16x16xf32> to vector<2x16xf32>
    %73 = vector.shape_cast %72 : vector<2x16xf32> to vector<2x16x1xf32>
    %74 = vector.broadcast %73 : vector<2x16x1xf32> to vector<2x16x16xf32>
    %75 = arith.subf %71, %74 : vector<2x16x16xf32>
    %76 = math.exp %75 : vector<2x16x16xf32>
    %cst_25 = arith.constant dense<0.000000e+00> : vector<2x16xf32>
    %77 = vector.multi_reduction <add>, %76, %cst_25 [2] : vector<2x16x16xf32> to vector<2x16xf32>
    %78 = vector.shape_cast %77 : vector<2x16xf32> to vector<2x16x1xf32>
    "tpu.trace_start"() <{level = 10 : i32, message = "bts,bsd->btd"}> : () -> ()
    %cst_26 = arith.constant dense<0.000000e+00> : vector<2x16x8xf32>
    %79 = tpu.matmul %76, %66, %cst_26 {dimension_numbers = #tpu.dot_dimension_numbers<[2], [1], [1], [2], [0, 0, 0, 1, 1, 2], [0], [0]>} : vector<2x16x16xf32>, vector<2x16x8xf32>, vector<2x16x8xf32> -> vector<2x16x8xf32>
    "tpu.trace_stop"() : () -> ()
    %80 = tpu.reciprocal %78 {approx = true} : vector<2x16x1xf32> -> vector<2x16x1xf32>
    %81 = vector.broadcast %80 : vector<2x16x1xf32> to vector<2x16x8xf32>
    %82 = arith.mulf %79, %81 : vector<2x16x8xf32>
    %c1 = arith.constant 1 : index
    %c0_27 = arith.constant 0 : index
    %c0_28 = arith.constant 0 : index
    %83 = vector.load %arg7[%c1, %c0_27, %c0_28] : memref<4x8x32xf32, #tpu.memory_space<vmem>>, vector<1x8x32xf32>
    %84 = vector.shape_cast %83 : vector<1x8x32xf32> to vector<8x32xf32>
    "tpu.trace_start"() <{level = 10 : i32, message = "btd,dc->btc"}> : () -> ()
    %cst_29 = arith.constant dense<0.000000e+00> : vector<2x16x32xf32>
    %85 = tpu.matmul %82, %84, %cst_29 {dimension_numbers = #tpu.dot_dimension_numbers<[2], [0], [0, 1], [1], [0, 0, 0, 1, 1, 1], [], []>} : vector<2x16x8xf32>, vector<8x32xf32>, vector<2x16x32xf32> -> vector<2x16x32xf32>
    "tpu.trace_stop"() : () -> ()
    %86 = arith.addf %63, %85 : vector<2x16x32xf32>
    %87 = vector.extract_strided_slice %33 {offsets = [0, 0, 16], sizes = [2, 16, 8], strides = [1, 1, 1]} : vector<2x16x32xf32> to vector<2x16x8xf32>
    %88 = vector.extract_strided_slice %35 {offsets = [0, 0, 16], sizes = [2, 16, 8], strides = [1, 1, 1]} : vector<2x16x32xf32> to vector<2x16x8xf32>
    %89 = vector.extract_strided_slice %37 {offsets = [0, 0, 16], sizes = [2, 16, 8], strides = [1, 1, 1]} : vector<2x16x32xf32> to vector<2x16x8xf32>
    "tpu.trace_start"() <{level = 10 : i32, message = "btd,bsd->bts"}> : () -> ()
    %cst_30 = arith.constant dense<0.000000e+00> : vector<2x16x16xf32>
    %90 = tpu.matmul %87, %88, %cst_30 {dimension_numbers = #tpu.dot_dimension_numbers<[2], [2], [1], [1], [0, 0, 0, 1, 1, 1], [0], [0]>} : vector<2x16x8xf32>, vector<2x16x8xf32>, vector<2x16x16xf32> -> vector<2x16x16xf32>
    %cst_31 = arith.constant 0xFF800000 : f32
    "tpu.trace_stop"() : () -> ()
    %91 = vector.shape_cast %41 : vector<1x16x16xi1> to vector<1x16x16xi1>
    %92 = vector.broadcast %91 : vector<1x16x16xi1> to vector<2x16x16xi1>
    %93 = vector.broadcast %cst_31 : f32 to vector<2x16x16xf32>
    %94 = arith.select %92, %90, %93 : vector<2x16x16xi1>, vector<2x16x16xf32>
    %cst_32 = arith.constant dense<0xFF800000> : vector<2x16xf32>
    %95 = vector.multi_reduction <maximumf>, %94, %cst_32 [2] : vector<2x16x16xf32> to vector<2x16xf32>
    %96 = vector.shape_cast %95 : vector<2x16xf32> to vector<2x16x1xf32>
    %97 = vector.broadcast %96 : vector<2x16x1xf32> to vector<2x16x16xf32>
    %98 = arith.subf %94, %97 : vector<2x16x16xf32>
    %99 = math.exp %98 : vector<2x16x16xf32>
    %cst_33 = arith.constant dense<0.000000e+00> : vector<2x16xf32>
    %100 = vector.multi_reduction <add>, %99, %cst_33 [2] : vector<2x16x16xf32> to vector<2x16xf32>
    %101 = vector.shape_cast %100 : vector<2x16xf32> to vector<2x16x1xf32>
    "tpu.trace_start"() <{level = 10 : i32, message = "bts,bsd->btd"}> : () -> ()
    %cst_34 = arith.constant dense<0.000000e+00> : vector<2x16x8xf32>
    %102 = tpu.matmul %99, %89, %cst_34 {dimension_numbers = #tpu.dot_dimension_numbers<[2], [1], [1], [2], [0, 0, 0, 1, 1, 2], [0], [0]>} : vector<2x16x16xf32>, vector<2x16x8xf32>, vector<2x16x8xf32> -> vector<2x16x8xf32>
    "tpu.trace_stop"() : () -> ()
    %103 = tpu.reciprocal %101 {approx = true} : vector<2x16x1xf32> -> vector<2x16x1xf32>
    %104 = vector.broadcast %103 : vector<2x16x1xf32> to vector<2x16x8xf32>
    %105 = arith.mulf %102, %104 : vector<2x16x8xf32>
    %c2 = arith.constant 2 : index
    %c0_35 = arith.constant 0 : index
    %c0_36 = arith.constant 0 : index
    %106 = vector.load %arg7[%c2, %c0_35, %c0_36] : memref<4x8x32xf32, #tpu.memory_space<vmem>>, vector<1x8x32xf32>
    %107 = vector.shape_cast %106 : vector<1x8x32xf32> to vector<8x32xf32>
    "tpu.trace_start"() <{level = 10 : i32, message = "btd,dc->btc"}> : () -> ()
    %cst_37 = arith.constant dense<0.000000e+00> : vector<2x16x32xf32>
    %108 = tpu.matmul %105, %107, %cst_37 {dimension_numbers = #tpu.dot_dimension_numbers<[2], [0], [0, 1], [1], [0, 0, 0, 1, 1, 1], [], []>} : vector<2x16x8xf32>, vector<8x32xf32>, vector<2x16x32xf32> -> vector<2x16x32xf32>
    "tpu.trace_stop"() : () -> ()
    %109 = arith.addf %86, %108 : vector<2x16x32xf32>
    %110 = vector.extract_strided_slice %33 {offsets = [0, 0, 24], sizes = [2, 16, 8], strides = [1, 1, 1]} : vector<2x16x32xf32> to vector<2x16x8xf32>
    %111 = vector.extract_strided_slice %35 {offsets = [0, 0, 24], sizes = [2, 16, 8], strides = [1, 1, 1]} : vector<2x16x32xf32> to vector<2x16x8xf32>
    %112 = vector.extract_strided_slice %37 {offsets = [0, 0, 24], sizes = [2, 16, 8], strides = [1, 1, 1]} : vector<2x16x32xf32> to vector<2x16x8xf32>
    "tpu.trace_start"() <{level = 10 : i32, message = "btd,bsd->bts"}> : () -> ()
    %cst_38 = arith.constant dense<0.000000e+00> : vector<2x16x16xf32>
    %113 = tpu.matmul %110, %111, %cst_38 {dimension_numbers = #tpu.dot_dimension_numbers<[2], [2], [1], [1], [0, 0, 0, 1, 1, 1], [0], [0]>} : vector<2x16x8xf32>, vector<2x16x8xf32>, vector<2x16x16xf32> -> vector<2x16x16xf32>
    %cst_39 = arith.constant 0xFF800000 : f32
    "tpu.trace_stop"() : () -> ()
    %114 = vector.shape_cast %41 : vector<1x16x16xi1> to vector<1x16x16xi1>
    %115 = vector.broadcast %114 : vector<1x16x16xi1> to vector<2x16x16xi1>
    %116 = vector.broadcast %cst_39 : f32 to vector<2x16x16xf32>
    %117 = arith.select %115, %113, %116 : vector<2x16x16xi1>, vector<2x16x16xf32>
    %cst_40 = arith.constant dense<0xFF800000> : vector<2x16xf32>
    %118 = vector.multi_reduction <maximumf>, %117, %cst_40 [2] : vector<2x16x16xf32> to vector<2x16xf32>
    %119 = vector.shape_cast %118 : vector<2x16xf32> to vector<2x16x1xf32>
    %120 = vector.broadcast %119 : vector<2x16x1xf32> to vector<2x16x16xf32>
    %121 = arith.subf %117, %120 : vector<2x16x16xf32>
    %122 = math.exp %121 : vector<2x16x16xf32>
    %cst_41 = arith.constant dense<0.000000e+00> : vector<2x16xf32>
    %123 = vector.multi_reduction <add>, %122, %cst_41 [2] : vector<2x16x16xf32> to vector<2x16xf32>
    %124 = vector.shape_cast %123 : vector<2x16xf32> to vector<2x16x1xf32>
    "tpu.trace_start"() <{level = 10 : i32, message = "bts,bsd->btd"}> : () -> ()
    %cst_42 = arith.constant dense<0.000000e+00> : vector<2x16x8xf32>
    %125 = tpu.matmul %122, %112, %cst_42 {dimension_numbers = #tpu.dot_dimension_numbers<[2], [1], [1], [2], [0, 0, 0, 1, 1, 2], [0], [0]>} : vector<2x16x16xf32>, vector<2x16x8xf32>, vector<2x16x8xf32> -> vector<2x16x8xf32>
    "tpu.trace_stop"() : () -> ()
    %126 = tpu.reciprocal %124 {approx = true} : vector<2x16x1xf32> -> vector<2x16x1xf32>
    %127 = vector.broadcast %126 : vector<2x16x1xf32> to vector<2x16x8xf32>
    %128 = arith.mulf %125, %127 : vector<2x16x8xf32>
    %c3 = arith.constant 3 : index
    %c0_43 = arith.constant 0 : index
    %c0_44 = arith.constant 0 : index
    %129 = vector.load %arg7[%c3, %c0_43, %c0_44] : memref<4x8x32xf32, #tpu.memory_space<vmem>>, vector<1x8x32xf32>
    %130 = vector.shape_cast %129 : vector<1x8x32xf32> to vector<8x32xf32>
    "tpu.trace_start"() <{level = 10 : i32, message = "btd,dc->btc"}> : () -> ()
    %cst_45 = arith.constant dense<0.000000e+00> : vector<2x16x32xf32>
    %131 = tpu.matmul %128, %130, %cst_45 {dimension_numbers = #tpu.dot_dimension_numbers<[2], [0], [0, 1], [1], [0, 0, 0, 1, 1, 1], [], []>} : vector<2x16x8xf32>, vector<8x32xf32>, vector<2x16x32xf32> -> vector<2x16x32xf32>
    "tpu.trace_stop"() : () -> ()
    %132 = arith.addf %109, %131 : vector<2x16x32xf32>
    %133 = vector.shape_cast %132 : vector<2x16x32xf32> to vector<32x32xf32>
    %134 = arith.addf %1, %133 : vector<32x32xf32>
    %c0_46 = arith.constant 0 : index
    %c0_47 = arith.constant 0 : index
    %135 = vector.load %arg4[%c0_46, %c0_47] : memref<1x32xf32, #tpu.memory_space<vmem>>, vector<1x32xf32>
    %136 = vector.shape_cast %135 : vector<1x32xf32> to vector<32xf32>
    %c0_48 = arith.constant 0 : index
    %c0_49 = arith.constant 0 : index
    %137 = vector.load %arg5[%c0_48, %c0_49] : memref<1x32xf32, #tpu.memory_space<vmem>>, vector<1x32xf32>
    %138 = vector.shape_cast %137 : vector<1x32xf32> to vector<32xf32>
    %cst_50 = arith.constant dense<0.000000e+00> : vector<32xf32>
    %139 = vector.multi_reduction <add>, %134, %cst_50 [1] : vector<32x32xf32> to vector<32xf32>
    %140 = vector.shape_cast %139 : vector<32xf32> to vector<32x1xf32>
    %cst_51 = arith.constant 3.200000e+01 : f32
    %141 = vector.broadcast %cst_51 : f32 to vector<32x1xf32>
    %142 = arith.divf %140, %141 : vector<32x1xf32>
    %143 = arith.mulf %134, %134 : vector<32x32xf32>
    %cst_52 = arith.constant dense<0.000000e+00> : vector<32xf32>
    %144 = vector.multi_reduction <add>, %143, %cst_52 [1] : vector<32x32xf32> to vector<32xf32>
    %145 = vector.shape_cast %144 : vector<32xf32> to vector<32x1xf32>
    %cst_53 = arith.constant 3.200000e+01 : f32
    %146 = vector.broadcast %cst_53 : f32 to vector<32x1xf32>
    %147 = arith.divf %145, %146 : vector<32x1xf32>
    %148 = arith.mulf %142, %142 : vector<32x1xf32>
    %149 = arith.subf %147, %148 : vector<32x1xf32>
    %150 = vector.broadcast %142 : vector<32x1xf32> to vector<32x32xf32>
    %151 = arith.subf %134, %150 : vector<32x32xf32>
    %cst_54 = arith.constant 9.99999974E-6 : f32
    %152 = vector.broadcast %cst_54 : f32 to vector<32x1xf32>
    %153 = arith.addf %149, %152 : vector<32x1xf32>
    %154 = math.rsqrt %153 : vector<32x1xf32>
    %155 = vector.broadcast %154 : vector<32x1xf32> to vector<32x32xf32>
    %156 = arith.mulf %151, %155 : vector<32x32xf32>
    %157 = vector.shape_cast %136 : vector<32xf32> to vector<1x32xf32>
    %158 = vector.broadcast %157 : vector<1x32xf32> to vector<32x32xf32>
    %159 = arith.mulf %156, %158 : vector<32x32xf32>
    %160 = vector.shape_cast %138 : vector<32xf32> to vector<1x32xf32>
    %161 = vector.broadcast %160 : vector<1x32xf32> to vector<32x32xf32>
    %162 = arith.addf %159, %161 : vector<32x32xf32>
    %c0_55 = arith.constant 0 : index
    %c0_56 = arith.constant 0 : index
    %163 = vector.load %arg8[%c0_55, %c0_56] : memref<32x128xf32, #tpu.memory_space<vmem>>, vector<32x128xf32>
    %cst_57 = arith.constant dense<0.000000e+00> : vector<32x128xf32>
    %164 = tpu.matmul %162, %163, %cst_57 {dimension_numbers = #tpu.dot_dimension_numbers<[1], [0], [0], [1], [0, 0, 1, 1], [], []>} : vector<32x32xf32>, vector<32x128xf32>, vector<32x128xf32> -> vector<32x128xf32>
    %cst_58 = arith.constant 0.000000e+00 : f32
    %165 = vector.broadcast %cst_58 : f32 to vector<32x128xf32>
    %166 = arith.maximumf %164, %165 : vector<32x128xf32>
    %c0_59 = arith.constant 0 : index
    %c0_60 = arith.constant 0 : index
    %167 = vector.load %arg9[%c0_59, %c0_60] : memref<128x32xf32, #tpu.memory_space<vmem>>, vector<128x32xf32>
    %cst_61 = arith.constant dense<0.000000e+00> : vector<32x32xf32>
    %168 = tpu.matmul %166, %167, %cst_61 {dimension_numbers = #tpu.dot_dimension_numbers<[1], [0], [0], [1], [0, 0, 1, 1], [], []>} : vector<32x128xf32>, vector<128x32xf32>, vector<32x32xf32> -> vector<32x32xf32>
    %169 = arith.addf %134, %168 : vector<32x32xf32>
    %170 = vector.shape_cast %169 : vector<32x32xf32> to vector<2x16x32xf32>
    %c0_62 = arith.constant 0 : index
    %c0_63 = arith.constant 0 : index
    %c0_64 = arith.constant 0 : index
    %171 = vector.load %arg10[%c0_62, %c0_63, %c0_64] : memref<2x16x32xf32, #tpu.memory_space<vmem>>, vector<2x16x32xf32>
    tpu.vector_store %arg10[%c0_62, %c0_63, %c0_64], %170 {strides = array<i32>} : memref<2x16x32xf32, #tpu.memory_space<vmem>>, vector<2x16x32xf32>,
    return
  }
  func.func @transform_0(%arg0: i32) -> (i32, i32, i32) {
    %c0_i32 = arith.constant 0 : i32
    %c0_i32_0 = arith.constant 0 : i32
    %c0_i32_1 = arith.constant 0 : i32
    return %arg0, %c0_i32, %c0_i32_0 : i32, i32, i32
  }
  func.func @transform_1(%arg0: i32) -> (i32, i32) {
    %c0_i32 = arith.constant 0 : i32
    %c0_i32_0 = arith.constant 0 : i32
    %c0_i32_1 = arith.constant 0 : i32
    return %c0_i32, %c0_i32_0 : i32, i32
  }
  func.func @transform_2(%arg0: i32) -> (i32, i32) {
    %c0_i32 = arith.constant 0 : i32
    %c0_i32_0 = arith.constant 0 : i32
    %c0_i32_1 = arith.constant 0 : i32
    return %c0_i32, %c0_i32_0 : i32, i32
  }
  func.func @transform_3(%arg0: i32) -> (i32, i32) {
    %c0_i32 = arith.constant 0 : i32
    %c0_i32_0 = arith.constant 0 : i32
    %c0_i32_1 = arith.constant 0 : i32
    return %c0_i32, %c0_i32_0 : i32, i32
  }
  func.func @transform_4(%arg0: i32) -> (i32, i32) {
    %c0_i32 = arith.constant 0 : i32
    %c0_i32_0 = arith.constant 0 : i32
    %c0_i32_1 = arith.constant 0 : i32
    return %c0_i32, %c0_i32_0 : i32, i32
  }
  func.func @transform_5(%arg0: i32) -> (i32, i32) {
    %c0_i32 = arith.constant 0 : i32
    %c0_i32_0 = arith.constant 0 : i32
    %c0_i32_1 = arith.constant 0 : i32
    return %c0_i32, %c0_i32_0 : i32, i32
  }
  func.func @transform_6(%arg0: i32) -> (i32, i32, i32) {
    %c0_i32 = arith.constant 0 : i32
    %c0_i32_0 = arith.constant 0 : i32
    %c0_i32_1 = arith.constant 0 : i32
    %c0_i32_2 = arith.constant 0 : i32
    return %c0_i32, %c0_i32_0, %c0_i32_1 : i32, i32, i32
  }
  func.func @transform_7(%arg0: i32) -> (i32, i32) {
    %c0_i32 = arith.constant 0 : i32
    %c0_i32_0 = arith.constant 0 : i32
    %c0_i32_1 = arith.constant 0 : i32
    return %c0_i32, %c0_i32_0 : i32, i32
  }
  func.func @transform_8(%arg0: i32) -> (i32, i32) {
    %c0_i32 = arith.constant 0 : i32
    %c0_i32_0 = arith.constant 0 : i32
    %c0_i32_1 = arith.constant 0 : i32
    return %c0_i32, %c0_i32_0 : i32, i32
  }
  func.func @transform_9(%arg0: i32) -> (i32, i32, i32) {
    %c0_i32 = arith.constant 0 : i32
    %c0_i32_0 = arith.constant 0 : i32
    %c0_i32_1 = arith.constant 0 : i32
    return %arg0, %c0_i32, %c0_i32_0 : i32, i32, i32
  }
}

</mosaic_0001>

<bundles_post_ra>
// kernel: tpu_custom_call.1
= control target key start
LH: loop header
LB: loop body
LE: loop exit
PB: predicated region body
PF: predicated region fallthrough
CT: control target
= control target key end

     0   :  { %14 = vsyncpa [#allocation3], 0  ;;  %s2952_s0 = inlined_call_operand.vmem [shape: f32[4,16,32], index: 0, kind: input, shape index: {}]   ;;  %s2953_s1 = inlined_call_operand.hbm [shape: f32[1,32], index: 1, kind: input, shape index: {}]   ;;  %s2954_s2 = inlined_call_operand.vmem [shape: f32[1,32], index: 2, kind: input, shape index: {}]   ;;  %s2955_s3 = inlined_call_operand.hbm [shape: f32[1,32], index: 3, kind: input, shape index: {}]   ;;  %s2956_s4 = inlined_call_operand.vmem [shape: f32[1,32], index: 4, kind: input, shape index: {}]   ;;  %s2957_s5 = inlined_call_operand.vmem [shape: f32[32,96], index: 5, kind: input, shape index: {}]   ;;  %s2958_s6 = inlined_call_operand.vmem [shape: f32[4,8,32], index: 6, kind: input, shape index: {}]   ;;  %s2959_s7 = inlined_call_operand.vmem [shape: f32[32,128], index: 7, kind: input, shape index: {}]   ;;  %s2960_s8 = inlined_call_operand.vmem [shape: f32[128,32], index: 8, kind: input, shape index: {}]   ;;  %s2961_s9 = inlined_call_operand.hbm [shape: f32[4,16,32], index: 9, kind: output, shape index: {}]  }
   0x1   :  { %15 = vsyncpa [#allocation6], 0 }
   0x2   :  { %16 = vsyncpa [#allocation4], 0 }
   0x3   :  { %18 = vsyncpa [#allocation4 + $0x1], 0  ;;  %s2329_s30 = smov 0   ;;  %s2331_s10 = smov 0  }
   0x4   :  { %s2333_s11 = smov 0   ;;  %s2335_s12 = smov 0  }
   0x5 LB: > { %s2350_s13 = sadd.s32 4294967295, %s2261_s12   ;;  %s1827_s14 = sadd.s32 4294967294, %s2261_s12   ;;  %s2261_s12 = sphi %s2335_s12, %s2974_s12   ;;  %s2257_s11 = sphi %s2333_s11, %s2973_s11   ;;  %s2253_s10 = sphi %s2331_s10, %s2972_s10   ;;  %s2249_s30 = sphi %s2329_s30, %s2971_s30  }
   0x6   : > { %s2354_s15 = sadd.s32 1, %s2261_s12   ;;  %s225_s16 = sadd.s32 1, %s2257_s11 }
   0x7   : > { %s222_s17 = ssub.s32 %s2261_s12, %s2354_s15  ;;  %p235_p0 = scmp.ne.s32.totalorder %s2257_s11, %s2253_s10 }
   0x8   : > { %p223_p1 = scmp.eq.s32.totalorder %s222_s17, 0  ;;  %p236_p2 = scmp.eq.s32.totalorder %s2350_s13, 1 }
   0x9   : > { %p241_p3 = scmp.ne.s32.totalorder %s2253_s10, %s2249_s30  ;;  %p242_p4 = scmp.eq.s32.totalorder %s1827_s14, 1 }
   0xa   : > { %s2365_s18 = scalar_select %p223_p1, %s2257_s11, %s225_s16  }
   0xb   : > { %p2367_p5 = por %p236_p2, %p235_p0  ;;  %p2371_p6 = por %p242_p4, %p241_p3 }
   0xc   : > { %p1828_p7 = scmp.ge.s32.totalorder %s2261_s12, 1  ;;  %p249_p8 = scmp.lt.s32.totalorder %s2261_s12, 3 }
   0xd   : > { %p1948_p9 = scmp.eq.s32.totalorder %s2350_s13, 0  ;;  %s261_s24 = sshll.u32 %s2953_s1, 4  ;;  %s262_s24 = int_to_ptr.hbm [resolvable:$true] %s261_s24 }
   0xe   : > { %p2378_p10 = pnand %p1828_p7, %p249_p8  ;;  %s2263_s25 = smov [#allocation2]  }
   0xf   : > { %s263_s26 = sshll.u32 %s2263_s25, 4  ;;  %s276_s29 = sshll.u32 %s2955_s3, 4  ;;  %s264_s26 = int_to_ptr.vmem [resolvable:$true] %s263_s26  ;;  %s277_s29 = int_to_ptr.hbm [resolvable:$true] %s276_s29 }
  0x10   : > { %p1937_p11 = pneg %p2378_p10  ;;  %s2264_s14 = smov [#allocation5]  }
  0x11   : > { %s278_s16 = sshll.u32 %s2264_s14, 4  ;;  %316 = sbr.rel (%p2378_p10) target bundleno = 2024 (0x7e8), region = 56  ;;  %s279_s16 = int_to_ptr.vmem [resolvable:$true] %s278_s16 }
  0x12   : > { %p1938_p12 = pnand %p1948_p9, %p1937_p11 }
  0x14   : > { %1940 = dma.hbm_to_vmem [thread:$0]  (!%p1938_p12), %s262_s24, 16, %s264_s26, [#allocation3]  }
  0x15   : > { %1943 = dma.hbm_to_vmem [thread:$0]  (!%p1938_p12), %s277_s29, 16, %s279_s16, [#allocation6]  }
  0x16   : > { %2236 = dma.done.wait (%p1948_p9), [#allocation3], 16  }
  0x17   : > { %2238 = vsyncadd (%p1948_p9), [#allocation3], 4294967280 }
  0x18   : > { %2240 = dma.done.wait (%p1948_p9), [#allocation6], 16  }
  0x19   : > { %2242 = vsyncadd (%p1948_p9), [#allocation6], 4294967280  ;;  %s1836_s17 = sshll.u32 %s2350_s13, 1  ;;  %vm373_vm0 = vcmask 261120   ;;  %v2265_v16 = vmov 32.0   ;;  %v494_v24 = vld [vmem:[%s2957_s5 + $0x18] sm:$0xff] }
  0x1a   : > { %p360_p13 = scmp.lt.s32.totalorder %s1836_s17, 3  ;;  %2045 = vrcp.f32 %v2265_v16  ;;  %519 = vmatpush.msra.mxu0 %v494_v24  ;;  %v493_v27 = vld [vmem:[%s2957_s5 + $0x10] sm:$0xff]  ;;  %v492_v30 = vld [vmem:[%s2957_s5 + $0x8] sm:$0xff]  ;;  %v491_v32 = vld [vmem:[%s2957_s5] sm:$0xff]  ;;  %s2266_s23 = smov 96   ;;  %vm549_vm14 = vcmask 64512  }
  0x1b   : > { %s2267_s25 = smov 88   ;;  %s2268_s26 = smov 120  }
  0x1c   : > { %s2976_s17 = smov (!%p360_p13, %s1836_s17), 3  ;;  %520 = vmatpush.msra.mxu0 %v493_v27  ;;  %s2269_s27 = smov 64  }
  0x1d   : > { %s1920_s22 = sshll.u32 %s2976_s17, 4  ;;  %s2270_s28 = smov 56  }
  0x1e   : > { %s2406_s24 = scalar_lea.vmem %s2952_s0, %s1920_s22  ;;  %521 = vmatpush.msra.mxu0 %v492_v30  ;;  %s2271_s29 = smov 80  }
  0x1f   : > { %v2409_v0 = vld [vmem:[%s2406_s24 + $0x8] sm:$0xff]  ;;  %v2412_v1 = vld [vmem:[%s2406_s24] sm:$0xff]  ;;  %v2415_v2 = vld [vmem:[%s2406_s24 + $0x10] sm:$0xff]  ;;  %s2272_s14 = smov 112   ;;  %s2273_s16 = smov 72  }
  0x20   : > { %v377_v3 = vsel %vm373_vm0, %v2409_v0, 0.0  ;;  %v374_v4 = vsel %vm373_vm0, %v2412_v1, 0.0  ;;  %v380_v5 = vsel %vm373_vm0, %v2415_v2, 0.0  ;;  %v398_v6 = vmul.f32 %v2409_v0, %v2409_v0  ;;  %v2433_v12 = vld [vmem:[%s2406_s24 + $0x18] sm:$0xff]  ;;  %v2046_v17 = vpop.eup %2045  ;;  %522 = vmatpush.msra.mxu0 %v491_v32  ;;  %s2274_s17 = smov 104   ;;  %s2275_s22 = smov 48  }
  0x21   : > { %378 = vadd.xlane.f32.xlu1 %v377_v3  ;;  %375 = vadd.xlane.f32.xlu0 %v374_v4  ;;  %v397_v7 = vmul.f32 %v2412_v1, %v2412_v1  ;;  %v399_v8 = vmul.f32 %v2415_v2, %v2415_v2  ;;  %v400_v13 = vmul.f32 %v2433_v12, %v2433_v12  ;;  %v383_v14 = vsel %vm373_vm0, %v2433_v12, 0.0 }
  0x22   : > { %381 = vadd.xlane.f32.xlu2 %v380_v5  ;;  %v404_v9 = vsel %vm373_vm0, %v398_v6, 0.0  ;;  %v387_v18 = vmul.f32 32.0, %v2046_v17  ;;  %vm391_vm1 = vweird.f32 %v2046_v17 }
  0x23   : > { %v401_v10 = vsel %vm373_vm0, %v397_v7, 0.0  ;;  %v407_v11 = vsel %vm373_vm0, %v399_v8, 0.0  ;;  %v410_v15 = vsel %vm373_vm0, %v400_v13, 0.0 }
  0x24   : > { %v388_v19 = vsub.f32 1.0, %v387_v18 }
  0x26   : > { %v389_v20 = vmul.f32 %v2046_v17, %v388_v19 }
  0x28   : > { %v390_v21 = vadd.f32 %v2046_v17, %v389_v20  ;;  %v2042_v20 = vld [vmem:[%s2954_s2] ss:$0 sm:$0xff] }
  0x29   : > { %405 = vadd.xlane.f32.xlu1 %v404_v9  ;;  %402 = vadd.xlane.f32.xlu0 %v401_v10 }
  0x2a   : > { %408 = vadd.xlane.f32.xlu2 %v407_v11  ;;  %v2443_v26 = vsel %vm391_vm1, %v2046_v17, %v390_v21 }
  0x31   : > { %384 = vadd.xlane.f32.xlu0 %v383_v14  ;;  %411 = vadd.xlane.f32.xlu1 %v410_v15  ;;  %v2041_v15 = vld [vmem:[#allocation2] ss:$0 sm:$0xff] }
  0x94   : > { %v379_v22 = vpop.xlane.xlu1 %378  ;;  %v376_v23 = vpop.xlane.xlu0 %375 }
  0x95   : > { %v382_v25 = vpop.xlane.xlu2 %381  ;;  %v2449_v28 = vmul.f32 %v2443_v26, %v379_v22  ;;  %v393_v31 = vmul.f32 %v2443_v26, %v376_v23 }
  0x96   : > { %v2452_v29 = vmul.f32 %v2443_v26, %v382_v25 }
  0x97   : > { %v418_v33 = vmul.f32 %v2449_v28, %v2449_v28  ;;  %v417_v37 = vmul.f32 %v393_v31, %v393_v31  ;;  %v425_v13 = vsub.f32 %v2412_v1, %v393_v31  ;;  %v426_v22 = vsub.f32 %v2409_v0, %v2449_v28 }
  0x98   : > { %v419_v36 = vmul.f32 %v2452_v29, %v2452_v29  ;;  %v427_v30 = vsub.f32 %v2415_v2, %v2452_v29 }
  0x9c   : > { %v406_v34 = vpop.xlane.xlu1 %405  ;;  %v403_v35 = vpop.xlane.xlu0 %402 }
  0x9d   : > { %v414_v38 = vmul.f32 %v406_v34, %v2443_v26  ;;  %v413_v39 = vmul.f32 %v403_v35, %v2443_v26  ;;  %v409_v40 = vpop.xlane.xlu2 %408 }
  0x9e   : > { %v415_v41 = vmul.f32 %v409_v40, %v2443_v26 }
  0x9f   : > { %v422_v42 = vsub.f32 %v414_v38, %v418_v33  ;;  %v421_v43 = vsub.f32 %v413_v39, %v417_v37 }
  0xa0   : > { %v423_v44 = vsub.f32 %v415_v41, %v419_v36 }
  0xa1   : > { %v430_v45 = vadd.f32 1e-05, %v422_v42  ;;  %v429_v46 = vadd.f32 1e-05, %v421_v43 }
  0xa2   : > { %v431_v47 = vadd.f32 1e-05, %v423_v44 }
  0xa3   : > { %2047 = vrsqrt.f32 %v430_v45  ;;  %vm449_vm2 = vweird.f32 %v430_v45  ;;  %vm439_vm6 = vweird.f32 %v429_v46 }
  0xa4   : > { %2049 = vrsqrt.f32 %v429_v46  ;;  %v385_v48 = vpop.xlane.xlu0 %384  ;;  %v412_v49 = vpop.xlane.xlu1 %411  ;;  %vm459_vm8 = vweird.f32 %v431_v47 }
  0xa5   : > { %2051 = vrsqrt.f32 %v431_v47  ;;  %v2469_v50 = vmul.f32 %v2443_v26, %v385_v48  ;;  %v416_v51 = vmul.f32 %v412_v49, %v2443_v26 }
  0xa7   : > { %v420_v52 = vmul.f32 %v2469_v50, %v2469_v50  ;;  %v428_v28 = vsub.f32 %v2433_v12, %v2469_v50 }
  0xa9   : > { %v2048_v53 = vpop.eup %2047  ;;  %v424_v54 = vsub.f32 %v416_v51, %v420_v52 }
  0xaa   : > { %v2050_v55 = vpop.eup %2049  ;;  %v444_v56 = vmul.f32 %v2048_v53, %v430_v45  ;;  %vm450_vm3 = vweird.f32 %v2048_v53 }
  0xab   : > { %v2052_v57 = vpop.eup %2051  ;;  %v434_v58 = vmul.f32 %v2050_v55, %v429_v46  ;;  %v432_v59 = vadd.f32 1e-05, %v424_v54  ;;  %vm440_vm4 = vweird.f32 %v2050_v55  ;;  %vm2474_vm5 = vmor %vm449_vm2, %vm450_vm3  ;;  %vm626_vm2 = vcmask 130048  }
  0xac   : > { %v445_v60 = vmul.f32 %v2048_v53, %v444_v56  ;;  %v454_v61 = vmul.f32 %v2052_v57, %v431_v47  ;;  %vm441_vm7 = vmor %vm439_vm6, %vm440_vm4  ;;  %vm460_vm9 = vweird.f32 %v2052_v57 }
  0xad   : > { %v435_v62 = vmul.f32 %v2050_v55, %v434_v58  ;;  %2053 = vrsqrt.f32 %v432_v59  ;;  %vm461_vm10 = vmor %vm459_vm8, %vm460_vm9  ;;  %vm469_vm11 = vweird.f32 %v432_v59 }
  0xae   : > { %v446_v63 = vmul.f32 0.5, %v445_v60  ;;  %v455_v3 = vmul.f32 %v2052_v57, %v454_v61  ;;  %v536_v61 = vlaneseq }
  0xaf   : > { %v436_v4 = vmul.f32 0.5, %v435_v62 }
  0xb0   : > { %v447_v5 = vsub.f32 1.5, %v446_v63  ;;  %v456_v7 = vmul.f32 0.5, %v455_v3  ;;  %v537_v62 = vshrl.u32 %v536_v61, 7  ;;  %v540_v63 = vand.u32 127, %v536_v61 }
  0xb1   : > { %v437_v6 = vsub.f32 1.5, %v436_v4 }
  0xb2   : > { %v448_v9 = vmul.f32 %v2048_v53, %v447_v5  ;;  %v457_v16 = vsub.f32 1.5, %v456_v7  ;;  %v538_v3 = vadd.s32 8, %v537_v62  ;;  %vm2546_vm15 = vcmp.ge.s32.totalorder %v537_v62, %v540_v63 }
  0xb3   : > { %v2054_v8 = vpop.eup %2053  ;;  %v438_v11 = vmul.f32 %v2050_v55, %v437_v6 }
  0xb4   : > { %v464_v14 = vmul.f32 %v2054_v8, %v432_v59  ;;  %v452_v21 = vsel %vm2474_vm5, %v2048_v53, %v448_v9  ;;  %v458_v23 = vmul.f32 %v2052_v57, %v457_v16  ;;  %vm470_vm12 = vweird.f32 %v2054_v8 }
  0xb5   : > { %v442_v17 = vsel %vm441_vm7, %v2050_v55, %v438_v11  ;;  %v474_v27 = vmul.f32 %v452_v21, %v426_v22  ;;  %vm471_vm13 = vmor %vm469_vm11, %vm470_vm12  ;;  %vm2550_vm1 = vcmp.ge.s32.totalorder %v538_v3, %v540_v63 }
  0xb6   : > { %v465_v18 = vmul.f32 %v2054_v8, %v464_v14  ;;  %v473_v19 = vmul.f32 %v442_v17, %v425_v13  ;;  %v462_v32 = vsel %vm461_vm10, %v2052_v57, %v458_v23 }
  0xb7   : > { %v481_v33 = vmul.f32 %v2041_v15, %v474_v27  ;;  %v475_v34 = vmul.f32 %v462_v32, %v427_v30 }
  0xb8   : > { %v480_v1 = vmul.f32 %v2041_v15, %v473_v19  ;;  %v466_v24 = vmul.f32 0.5, %v465_v18 }
  0xb9   : > { %v488_v0 = vadd.f32 %v2042_v20, %v481_v33  ;;  %v482_v36 = vmul.f32 %v2041_v15, %v475_v34 }
  0xba   : > { %v487_v25 = vadd.f32 %v2042_v20, %v480_v1  ;;  %v467_v31 = vsub.f32 1.5, %v466_v24 }
  0xbb   : > { %v489_v38 = vadd.f32 %v2042_v20, %v482_v36 }
  0xbc   : > { %1839 = vmatmul.msk.f32.vlgmr.msra.gmra.mxu0 %vm373_vm0, %v487_v25  ;;  %v468_v35 = vmul.f32 %v2054_v8, %v467_v31 }
  0xbe   : > { %v472_v37 = vsel %vm471_vm13, %v2054_v8, %v468_v35 }
  0xbf   : > { %v476_v2 = vmul.f32 %v472_v37, %v428_v28 }
  0xc1   : > { %v483_v29 = vmul.f32 %v2041_v15, %v476_v2 }
  0xc3   : > { %v490_v39 = vadd.f32 %v2042_v20, %v483_v29 }
  0xc4   : > { %1840 = vmatmul.msk.f32.gmra.mxu0 %vm373_vm0, %v488_v0 }
  0xcc   : > { %1841 = vmatmul.msk.f32.gmra.mxu0 %vm373_vm0, %v489_v38 }
  0xd4   : > { %1842 = vmatmul.msk.f32.gmra.mxu0 %vm373_vm0, %v490_v39 }
 0x139   : > { %v2494_v40 = vpop.f32.mrf.mxu0 }
 0x13a   : > { %545 = vrot.lane.b32.xlu0 %v2494_v40, %s2266_s23 }
 0x141   : > { %v2497_v41 = vpop.f32.mrf.mxu0 }
 0x142   : > { %748 = vrot.lane.b32.xlu0 %v2497_v41, %s2267_s25  ;;  %547 = vrot.lane.b32.xlu2 %v2497_v41, %s2266_s23  ;;  %v2521_v44 = vpack.i.bf16 %v2494_v40, %v2497_v41 }
 0x149   : > { %v2501_v12 = vpop.f32.mrf.mxu0 }
 0x14a   : > { %744 = vrot.lane.b32.xlu0 %v2497_v41, %s2268_s26  ;;  %583 = vrot.lane.b32.xlu2 %v2501_v12, %s2266_s23 }
 0x151   : > { %v2506_v42 = vpop.f32.mrf.mxu0 }
 0x152   : > { %746 = vrot.lane.b32.xlu2 %v2494_v40, %s2267_s25  ;;  %585 = vrot.lane.b32.xlu1 %v2506_v42, %s2266_s23  ;;  %v2512_v43 = vpack.i.bf16 %v2501_v12, %v2506_v42 }
 0x154   : > { %2007 = vrot.lane.b32.xlu0 %v2512_v43, %s2269_s27 }
 0x15a   : > { %781 = vrot.lane.b32.xlu2 %v2501_v12, %s2268_s26  ;;  %742 = vrot.lane.b32.xlu1 %v2494_v40, %s2268_s26 }
 0x162   : > { %2002 = vrot.lane.b32.xlu1 %v2521_v44, %s2269_s27 }
 0x16a   : > { %785 = vrot.lane.b32.xlu1 %v2501_v12, %s2267_s25 }
 0x172   : > { %787 = vrot.lane.b32.xlu1 %v2506_v42, %s2267_s25  ;;  %s2276_s25 = smov 40  }
 0x19c   : > { %v548_v45 = vpop.permute.xlu2 %547 }
 0x19d   : > { %1843 = vmatpush.xpose.msk.msrb.mxu0 %vm549_vm14, %v548_v45  ;;  %1923 = vmatpush.xpose.msk.msra.mxu1 %vm549_vm14, %v548_v45 }
 0x1a4   : > { %v584_v47 = vpop.permute.xlu2 %583 }
 0x1ac   : > { %v546_v46 = vpop.permute.xlu0 %545  ;;  %v747_v49 = vpop.permute.xlu2 %746 }
 0x1ad   : > { %1844 = vmatpush.xpose.msk.msrb.mxu0 %vm549_vm14, %v546_v46  ;;  %1924 = vmatpush.xpose.msk.msra.mxu1 %vm549_vm14, %v546_v46 }
 0x1b0   : > { %1845 = vmatmul.msk.f32.vlgmr.msrb.gmra.mxu0 %vm549_vm14, %v2494_v40  ;;  %1846 = vmatmul.msk.f32.vlgmr.msra.gmra.mxu1 %vm549_vm14, %v2497_v41 }
 0x1b4   : > { %v749_v48 = vpop.permute.xlu0 %748  ;;  %v782_v24 = vpop.permute.xlu2 %781 }
 0x1b5   : > { %1855 = vmatpush.xpose.msk.msrb.mxu1 %vm549_vm14, %v749_v48 }
 0x1b9   : > { %1856 = vmatpush.xpose.msk.msrb.mxu1 %vm549_vm14, %v747_v49 }
 0x1bc   : > { %v745_v52 = vpop.permute.xlu0 %744 }
 0x1c4   : > { %v586_v50 = vpop.permute.xlu1 %585 }
 0x1c5   : > { %1847 = vmatpush.xpose.msk.msra.mxu2 %vm549_vm14, %v586_v50 }
 0x1c6   : > { %v2008_v54 = vpop.permute.xlu0 %2007 }
 0x1c7   : > { %v2009_v57 = vunpack.i.l.bf16 %v2008_v54  ;;  %v2010_v58 = vunpack.i.h.bf16 %v2008_v54 }
 0x1c9   : > { %1848 = vmatpush.xpose.msk.msra.mxu2 %vm549_vm14, %v584_v47 }
 0x1cc   : > { %1849 = vmatmul.msk.f32.vlgmr.msra.gmra.mxu2 %vm549_vm14, %v2501_v12  ;;  %v743_v51 = vpop.permute.xlu1 %742 }
 0x1cd   : > { %1857 = vmatmul.msk.f32.vlgmr.msrb.gmra.mxu1 %vm549_vm14, %v743_v51 }
 0x1d4   : > { %1850 = vmatmul.msk.f32.gmra.mxu2 %vm549_vm14, %v2506_v42  ;;  %v2003_v53 = vpop.permute.xlu1 %2002 }
 0x1d5   : > { %1858 = vmatmul.msk.f32.gmra.mxu1 %vm549_vm14, %v745_v52  ;;  %v2004_v55 = vunpack.i.l.bf16 %v2003_v53  ;;  %v2005_v56 = vunpack.i.h.bf16 %v2003_v53 }
 0x1d7   : > { %689 = vmatpush.msrb.mxu2 %v2004_v55  ;;  %1925 = vmatpush.msra.mxu3 %v2004_v55 }
 0x1d9   : > { %690 = vmatpush.msrb.mxu2 %v2005_v56  ;;  %1926 = vmatpush.msra.mxu3 %v2005_v56 }
 0x1db   : > { %724 = vmatpush.msrb.mxu3 %v2009_v57 }
 0x1dc   : > { %v786_v59 = vpop.permute.xlu1 %785 }
 0x1dd   : > { %725 = vmatpush.msrb.mxu3 %v2010_v58 }
 0x1e4   : > { %v788_v60 = vpop.permute.xlu1 %787 }
 0x1e5   : > { %1859 = vmatpush.xpose.msk.msra.mxu2 %vm549_vm14, %v788_v60 }
 0x1e9   : > { %1860 = vmatpush.xpose.msk.msra.mxu2 %vm549_vm14, %v786_v59 }
 0x22d   : > { %v575_v6 = vpop.f32.mrf.mxu0  ;;  %v578_v7 = vpop.f32.mrf.mxu1 }
 0x22e   : > { %v622_v8 = vsel %vm2546_vm15, %v575_v6, -inf  ;;  %v623_v9 = vsel %vm2550_vm1, %v578_v7, -inf }
 0x22f   : > { %v630_v10 = vsel %vm626_vm2, %v623_v9, -inf  ;;  %v627_v11 = vsel %vm626_vm2, %v622_v8, -inf }
 0x230   : > { %631 = vmax.xlane.f32.xlu0 %v630_v10  ;;  %628 = vmax.xlane.f32.xlu2 %v627_v11 }
 0x244   : > { %2012 = vrot.lane.b32.xlu0 %v2521_v44, %s2270_s28 }
 0x248   : > { %783 = vrot.lane.b32.xlu2 %v2506_v42, %s2268_s26  ;;  %s356_s26 = sand.u32 1, %s2253_s10  }
 0x249   : > { %s1835_s27 = sshll.u32 %s356_s26, 5  ;;  %s1727_s23 = scalar_lea.sflag [#allocation4], %s356_s26 }
 0x24a   : > { %v775_v13 = vpop.f32.mrf.mxu1 }
 0x24b   : > { %v2565_v14 = vsel %vm2546_vm15, %v775_v13, -inf }
 0x24c   : > { %1026 = vrot.lane.b32.xlu0 %v2494_v40, %s2271_s29  ;;  %v824_v15 = vsel %vm626_vm2, %v2565_v14, -inf }
 0x24d   : > { %825 = vmax.xlane.f32.xlu1 %v824_v15 }
 0x24f   : > { %v612_v16 = vpop.f32.mrf.mxu2 }
 0x250   : > { %v624_v17 = vsel %vm2546_vm15, %v612_v16, -inf }
 0x251   : > { %v633_v18 = vsel %vm626_vm2, %v624_v17, -inf }
 0x252   : > { %v778_v19 = vpop.f32.mrf.mxu1 }
 0x253   : > { %v2578_v20 = vsel %vm2550_vm1, %v778_v19, -inf }
 0x254   : > { %1022 = vrot.lane.b32.xlu0 %v2494_v40, %s2272_s14  ;;  %v827_v21 = vsel %vm626_vm2, %v2578_v20, -inf }
 0x255   : > { %634 = vmax.xlane.f32.xlu1 %v633_v18 }
 0x257   : > { %v615_v22 = vpop.f32.mrf.mxu2 }
 0x258   : > { %v625_v1 = vsel %vm2550_vm1, %v615_v22, -inf }
 0x259   : > { %v636_v23 = vsel %vm626_vm2, %v625_v1, -inf }
 0x26e   : > { %1028 = vrot.lane.b32.xlu1 %v2497_v41, %s2271_s29 }
 0x271   : > { %828 = vmax.xlane.f32.xlu2 %v827_v21 }
 0x27e   : > { %637 = vmax.xlane.f32.xlu0 %v636_v23 }
 0x289   : > { %2017 = vrot.lane.b32.xlu2 %v2512_v43, %s2270_s28  ;;  %s358_s28 = scalar_lea.vmem [#allocation7], %s1835_s27 }
 0x292   : > { %1024 = vrot.lane.b32.xlu0 %v2497_v41, %s2272_s14 }
 0x2a3   : > { %v629_v25 = vpop.xlane.xlu2 %628  ;;  %v632_v27 = vpop.xlane.xlu0 %631 }
 0x2a4   : > { %v639_v30 = vsub.f32 %v622_v8, %v629_v25  ;;  %v640_v31 = vsub.f32 %v623_v9, %v632_v27 }
 0x2a6   : > { %v643_v32 = vmul.f32 1.442695, %v639_v30  ;;  %v645_v33 = vmul.f32 1.442695, %v640_v31 }
 0x2a8   : > { %2055 = vpow2.f32 %v643_v32 }
 0x2a9   : > { %2057 = vpow2.f32 %v645_v33 }
 0x2ab   : > { %v784_v2 = vpop.permute.xlu2 %783 }
 0x2ae   : > { %v2056_v34 = vpop.eup %2055 }
 0x2af   : > { %v2058_v35 = vpop.eup %2057  ;;  %1851 = vmatmul.msk.f32.vlgmr.msrb.gmra.mxu2 %vm626_vm2, %v2056_v34  ;;  %v651_v28 = vsel %vm626_vm2, %v2056_v34, 0.0 }
 0x2b0   : > { %1852 = vmatmul.msk.f32.vlgmr.msra.gmra.mxu3 %vm626_vm2, %v2058_v35  ;;  %v654_v0 = vsel %vm626_vm2, %v2058_v35, 0.0 }
 0x2b1   : > { %655 = vadd.xlane.f32.xlu1 %v654_v0 }
 0x2b2   : > { %652 = vadd.xlane.f32.xlu2 %v651_v28 }
 0x2b6   : > { %v2013_v36 = vpop.permute.xlu0 %2012 }
 0x2b7   : > { %v2014_v37 = vunpack.i.l.bf16 %v2013_v36  ;;  %1861 = vmatmul.msk.f32.vlgmr.msra.gmra.mxu2 %vm549_vm14, %v782_v24  ;;  %v2015_v38 = vunpack.i.h.bf16 %v2013_v36  ;;  %v741_v36 = vld [vmem:[%s2958_s6] sm:$0xff] }
 0x2b9   : > { %886 = vmatpush.msra.mxu3 %v2014_v37 }
 0x2bb   : > { %887 = vmatpush.msra.mxu3 %v2015_v38 }
 0x2be   : > { %v1027_v49 = vpop.permute.xlu0 %1026 }
 0x2bf   : > { %1862 = vmatmul.msk.f32.gmra.mxu2 %vm549_vm14, %v784_v2 }
 0x2c0   : > { %v826_v29 = vpop.xlane.xlu1 %825 }
 0x2c1   : > { %v836_v59 = vsub.f32 %v2565_v14, %v826_v29 }
 0x2c3   : > { %v840_v60 = vmul.f32 1.442695, %v836_v59 }
 0x2c6   : > { %v1023_v52 = vpop.permute.xlu0 %1022 }
 0x2c8   : > { %v635_v39 = vpop.xlane.xlu1 %634 }
 0x2c9   : > { %v641_v45 = vsub.f32 %v624_v17, %v635_v39 }
 0x2ca   : > { %1061 = vrot.lane.b32.xlu2 %v2501_v12, %s2272_s14 }
 0x2cb   : > { %v647_v46 = vmul.f32 1.442695, %v641_v45 }
 0x2cd   : > { %2059 = vpow2.f32 %v647_v46 }
 0x2d2   : > { %1063 = vrot.lane.b32.xlu2 %v2506_v42, %s2272_s14 }
 0x2d3   : > { %v2060_v47 = vpop.eup %2059 }
 0x2d4   : > { %1853 = vmatmul.msk.f32.vlgmr.msrb.gmra.mxu3 %vm626_vm2, %v2060_v47  ;;  %v657_v48 = vsel %vm626_vm2, %v2060_v47, 0.0 }
 0x2d5   : > { %658 = vadd.xlane.f32.xlu0 %v657_v48 }
 0x2da   : > { %1310 = vrot.lane.b32.xlu2 %v2506_v42, %s2273_s16 }
 0x2e0   : > { %v1029_v50 = vpop.permute.xlu1 %1028 }
 0x2e1   : > { %1876 = vmatpush.xpose.msk.msrb.mxu3 %vm549_vm14, %v1029_v50 }
 0x2e2   : > { %1267 = vrot.lane.b32.xlu2 %v2497_v41, %s2274_s17 }
 0x2e4   : > { %v829_v51 = vpop.xlane.xlu2 %828 }
 0x2e5   : > { %1877 = vmatpush.xpose.msk.msrb.mxu3 %vm549_vm14, %v1027_v49  ;;  %v837_v63 = vsub.f32 %v2578_v20, %v829_v51 }
 0x2e7   : > { %v842_v3 = vmul.f32 1.442695, %v837_v63 }
 0x2e9   : > { %1065 = vrot.lane.b32.xlu0 %v2501_v12, %s2271_s29 }
 0x2ec   : > { %v2018_v53 = vpop.permute.xlu2 %2017 }
 0x2ed   : > { %v2019_v54 = vunpack.i.l.bf16 %v2018_v53  ;;  %v2020_v55 = vunpack.i.h.bf16 %v2018_v53 }
 0x2ef   : > { %921 = vmatpush.msrb.mxu2 %v2019_v54 }
 0x2f1   : > { %2022 = vrot.lane.b32.xlu0 %v2521_v44, %s2275_s22  ;;  %922 = vmatpush.msrb.mxu2 %v2020_v55  ;;  %v638_v56 = vpop.xlane.xlu0 %637 }
 0x2f2   : > { %v642_v57 = vsub.f32 %v625_v1, %v638_v56 }
 0x2f3   : > { %1008 = vmatpush.msra.mxu2 %v741_v36 }
 0x2f4   : > { %v649_v58 = vmul.f32 1.442695, %v642_v57 }
 0x2f6   : > { %2061 = vpow2.f32 %v649_v58 }
 0x2f7   : > { %2063 = vpow2.f32 %v840_v60 }
 0x2f8   : > { %2065 = vpow2.f32 %v842_v3 }
 0x2f9   : > { %1271 = vrot.lane.b32.xlu0 %v2497_v41, %s2273_s16 }
 0x2fc   : > { %v2062_v61 = vpop.eup %2061 }
 0x2fd   : > { %1854 = vmatmul.msk.f32.gmra.mxu3 %vm626_vm2, %v2062_v61  ;;  %v660_v62 = vsel %vm626_vm2, %v2062_v61, 0.0  ;;  %v2620_v6 = vpop.eup %2063 }
 0x2fe   : > { %661 = vadd.xlane.f32.xlu1 %v660_v62  ;;  %v2626_v41 = vpop.eup %2065 }
 0x301   : > { %1269 = vrot.lane.b32.xlu0 %v2494_v40, %s2273_s16 }
 0x304   : > { %v1025_v7 = vpop.permute.xlu0 %1024 }
 0x305   : > { %1863 = vmatmul.msk.f32.vlgmr.msra.gmra.mxu3 %vm626_vm2, %v2620_v6 }
 0x309   : > { %1265 = vrot.lane.b32.xlu0 %v2494_v40, %s2274_s17 }
 0x30d   : > { %1864 = vmatmul.msk.f32.gmra.mxu3 %vm626_vm2, %v2626_v41 }
 0x315   : > { %1878 = vmatmul.msk.f32.vlgmr.msrb.gmra.mxu3 %vm549_vm14, %v1023_v52 }
 0x31d   : > { %1879 = vmatmul.msk.f32.gmra.mxu3 %vm549_vm14, %v1025_v7 }
 0x324   : > { %v656_v38 = vpop.xlane.xlu1 %655 }
 0x325   : > { %v653_v8 = vpop.xlane.xlu2 %652 }
 0x326   : > { %2067 = vrcp.f32 %v653_v8 }
 0x32c   : > { %v2068_v9 = vpop.eup %2067 }
 0x32d   : > { %v1062_v20 = vpop.permute.xlu2 %1061 }
 0x332   : > { %v692_v10 = vpop.f32.mrf.mxu2 }
 0x333   : > { %v2632_v11 = vmul.f32 %v2068_v9, %v692_v10  ;;  %v695_v19 = vpop.f32.mrf.mxu3 }
 0x335   : > { %v1064_v24 = vpop.permute.xlu2 %1063 }
 0x33a   : > { %v814_v13 = vpop.f32.mrf.mxu2 }
 0x33b   : > { %v822_v40 = vsel %vm2546_vm15, %v814_v13, -inf }
 0x33c   : > { %v830_v14 = vsel %vm626_vm2, %v822_v40, -inf }
 0x33d   : > { %831 = vmax.xlane.f32.xlu1 %v830_v14  ;;  %v1311_v31 = vpop.permute.xlu2 %1310 }
 0x342   : > { %v817_v15 = vpop.f32.mrf.mxu2 }
 0x343   : > { %v823_v16 = vsel %vm2550_vm1, %v817_v15, -inf }
 0x344   : > { %v833_v17 = vsel %vm626_vm2, %v823_v16, -inf }
 0x345   : > { %834 = vmax.xlane.f32.xlu0 %v833_v17  ;;  %v1268_v60 = vpop.permute.xlu2 %1267 }
 0x348   : > { %v659_v18 = vpop.xlane.xlu0 %658 }
 0x349   : > { %2069 = vrcp.f32 %v659_v18 }
 0x34f   : > { %v2070_v21 = vpop.eup %2069 }
 0x356   : > { %1067 = vrot.lane.b32.xlu1 %v2506_v42, %s2271_s29  ;;  %s1922_s29 = sshll.u32 %s2350_s13, 5 }
 0x357   : > { %v727_v22 = vpop.f32.mrf.mxu3 }
 0x358   : > { %v739_v1 = vmul.f32 %v2070_v21, %v727_v22 }
 0x359   : > { %1308 = vrot.lane.b32.xlu0 %v2501_v12, %s2273_s16 }
 0x35b   : > { %v1066_v23 = vpop.permute.xlu0 %1065 }
 0x363   : > { %v2023_v25 = vpop.permute.xlu0 %2022 }
 0x364   : > { %v2024_v27 = vunpack.i.l.bf16 %v2023_v25  ;;  %v2025_v30 = vunpack.i.h.bf16 %v2023_v25 }
 0x366   : > { %1166 = vmatpush.msra.mxu3 %v2024_v27 }
 0x368   : > { %1167 = vmatpush.msra.mxu3 %v2025_v30 }
 0x36a   : > { %1897 = vmatpush.xpose.msk.msrb.mxu3 %vm549_vm14, %v1311_v31 }
 0x36b   : > { %v1272_v37 = vpop.permute.xlu0 %1271 }
 0x371   : > { %v662_v46 = vpop.xlane.xlu1 %661 }
 0x373   : > { %v1270_v45 = vpop.permute.xlu0 %1269 }
 0x37b   : > { %v1266_v47 = vpop.permute.xlu0 %1265 }
 0x380   : > { %v730_v32 = vpop.f32.mrf.mxu3 }
 0x388   : > { %v2645_v33 = vpop.f32.mrf.mxu3 }
 0x390   : > { %v2647_v34 = vpop.f32.mrf.mxu3 }
 0x398   : > { %v1055_v35 = vpop.f32.mrf.mxu3 }
 0x399   : > { %v1100_v0 = vsel %vm2546_vm15, %v1055_v35, -inf }
 0x39a   : > { %v1104_v28 = vsel %vm626_vm2, %v1100_v0, -inf }
 0x39b   : > { %1105 = vmax.xlane.f32.xlu0 %v1104_v28  ;;  %v851_v28 = vsel %vm626_vm2, %v2626_v41, 0.0 }
 0x3a0   : > { %v1058_v2 = vpop.f32.mrf.mxu3 }
 0x3a1   : > { %v1101_v29 = vsel %vm2550_vm1, %v1058_v2, -inf  ;;  %v848_v2 = vsel %vm626_vm2, %v2620_v6, 0.0 }
 0x3a2   : > { %v1107_v39 = vsel %vm626_vm2, %v1101_v29, -inf }
 0x3a3   : > { %1108 = vmax.xlane.f32.xlu1 %v1107_v39 }
 0x3af   : > { %1304 = vrot.lane.b32.xlu0 %v2501_v12, %s2274_s17 }
 0x3b0   : > { %v832_v48 = vpop.xlane.xlu1 %831 }
 0x3b1   : > { %v838_v49 = vsub.f32 %v822_v40, %v832_v48 }
 0x3b3   : > { %v844_v50 = vmul.f32 1.442695, %v838_v49 }
 0x3b5   : > { %2071 = vpow2.f32 %v844_v50 }
 0x3b8   : > { %v835_v51 = vpop.xlane.xlu0 %834 }
 0x3b9   : > { %v839_v52 = vsub.f32 %v823_v16, %v835_v51 }
 0x3bb   : > { %v2660_v53 = vpop.eup %2071  ;;  %v846_v54 = vmul.f32 1.442695, %v839_v52 }
 0x3bc   : > { %1865 = vmatmul.msk.f32.vlgmr.msrb.gmra.mxu2 %vm626_vm2, %v2660_v53  ;;  %1306 = vrot.lane.b32.xlu1 %v2506_v42, %s2274_s17  ;;  %s1739_s17 = scalar_lea.hbm %s2961_s9, %s1922_s29  ;;  %s2211_s29 = scalar_lea.hbm %s2961_s9, 64 }
 0x3bd   : > { %2073 = vpow2.f32 %v846_v54  ;;  %1893 = vmatpush.xpose.msk.msrb.mxu2 %vm549_vm14, %v1272_v37  ;;  %s1742_s21 = sshll.u32 %s1739_s17, 4  ;;  %s1743_s21 = int_to_ptr.hbm [resolvable:$true] %s1742_s21 }
 0x3be   : > { %2075 = vrcp.f32 %v656_v38  ;;  %s2205_s13 = sshra.s32 %s1743_s21, 4  ;;  %s2206_s13 = int_to_ptr.hbm [resolvable:$true] %s2205_s13 }
 0x3bf   : > { %2077 = vrcp.f32 %v662_v46  ;;  %p2212_p3 = scmp.lt.s32.totalorder %s2206_s13, %s2961_s9 }
 0x3c1   : > { %1894 = vmatpush.xpose.msk.msrb.mxu2 %vm549_vm14, %v1270_v45 }
 0x3c3   : > { %v2668_v12 = vpop.eup %2073 }
 0x3c4   : > { %1866 = vmatmul.msk.f32.gmra.mxu2 %vm626_vm2, %v2668_v12  ;;  %2027 = vrot.lane.b32.xlu1 %v2512_v43, %s2275_s22  ;;  %v2076_v42 = vpop.eup %2075  ;;  %v857_v37 = vsel %vm626_vm2, %v2668_v12, 0.0  ;;  %s1740_s22 = sshll.u32 %s358_s28, 4  ;;  %s1741_s22 = int_to_ptr.vmem [resolvable:$true] %s1740_s22 }
 0x3c5   : > { %v738_v57 = vmul.f32 %v2076_v42, %v695_v19  ;;  %v2078_v58 = vpop.eup %2077 }
 0x3c6   : > { %v740_v59 = vmul.f32 %v2078_v58, %v730_v32 }
 0x3c8   : > { %v1068_v55 = vpop.permute.xlu1 %1067 }
 0x3c9   : > { %1880 = vmatpush.xpose.msk.msra.mxu0 %vm549_vm14, %v1068_v55 }
 0x3cb   : > { %v1309_v56 = vpop.permute.xlu0 %1308 }
 0x3cc   : > { %1872 = vmatmul.msk.f32.vlgmr.msra.gmra.mxu2 %vm549_vm14, %v2632_v11  ;;  %1898 = vmatpush.xpose.msk.msrb.mxu3 %vm549_vm14, %v1309_v56 }
 0x3cd   : > { %1881 = vmatpush.xpose.msk.msra.mxu0 %vm549_vm14, %v1066_v23 }
 0x3d0   : > { %1882 = vmatmul.msk.f32.vlgmr.msra.gmra.mxu0 %vm549_vm14, %v1062_v20 }
 0x3d4   : > { %1873 = vmatmul.msk.f32.gmra.mxu2 %vm549_vm14, %v738_v57 }
 0x3d8   : > { %1883 = vmatmul.msk.f32.gmra.mxu0 %vm549_vm14, %v1064_v24 }
 0x3dc   : > { %1874 = vmatmul.msk.f32.gmra.mxu2 %vm549_vm14, %v739_v1 }
 0x3e4   : > { %1875 = vmatmul.msk.f32.gmra.mxu2 %vm549_vm14, %v740_v59 }
 0x3ec   : > { %1895 = vmatmul.msk.f32.vlgmr.msrb.gmra.mxu2 %vm549_vm14, %v1266_v47 }
 0x3f4   : > { %1896 = vmatmul.msk.f32.gmra.mxu2 %vm549_vm14, %v1268_v60 }
 0x40e   : > { %v1106_v61 = vpop.xlane.xlu0 %1105 }
 0x40f   : > { %v1116_v62 = vsub.f32 %v1100_v0, %v1106_v61 }
 0x411   : > { %v1120_v63 = vmul.f32 1.442695, %v1116_v62 }
 0x413   : > { %2079 = vpow2.f32 %v1120_v63 }
 0x416   : > { %v1109_v3 = vpop.xlane.xlu1 %1108 }
 0x417   : > { %v1117_v7 = vsub.f32 %v1101_v29, %v1109_v3 }
 0x419   : > { %v2080_v8 = vpop.eup %2079  ;;  %v1122_v9 = vmul.f32 1.442695, %v1117_v7 }
 0x41a   : > { %1884 = vmatmul.msk.f32.vlgmr.msra.gmra.mxu3 %vm626_vm2, %v2080_v8  ;;  %v1128_v38 = vsel %vm626_vm2, %v2080_v8, 0.0 }
 0x41b   : > { %2081 = vpow2.f32 %v1122_v9 }
 0x421   : > { %v2082_v10 = vpop.eup %2081  ;;  %v1305_v11 = vpop.permute.xlu0 %1304 }
 0x422   : > { %1885 = vmatmul.msk.f32.gmra.mxu3 %vm626_vm2, %v2082_v10  ;;  %v1131_v29 = vsel %vm626_vm2, %v2082_v10, 0.0 }
 0x42a   : > { %1899 = vmatmul.msk.f32.vlgmr.msrb.gmra.mxu3 %vm549_vm14, %v1305_v11 }
 0x42e   : > { %v1307_v13 = vpop.permute.xlu1 %1306 }
 0x432   : > { %1900 = vmatmul.msk.f32.gmra.mxu3 %vm549_vm14, %v1307_v13 }
 0x436   : > { %v2028_v40 = vpop.permute.xlu1 %2027 }
 0x437   : > { %v2029_v14 = vunpack.i.l.bf16 %v2028_v40  ;;  %v2030_v15 = vunpack.i.h.bf16 %v2028_v40 }
 0x439   : > { %1201 = vmatpush.msrb.mxu0 %v2029_v14 }
 0x43b   : > { %1202 = vmatpush.msrb.mxu0 %v2030_v15  ;;  %v1888_v15 = vld [vmem:[%s2958_s6 + $0x10] sm:$0xff] }
 0x43f   : > { %v2690_v16 = vpop.f32.mrf.mxu2 }
 0x447   : > { %v2692_v17 = vpop.f32.mrf.mxu2 }
 0x44d   : > { %v1094_v18 = vpop.f32.mrf.mxu0 }
 0x44e   : > { %v1102_v19 = vsel %vm2546_vm15, %v1094_v18, -inf }
 0x44f   : > { %v2696_v20 = vpop.f32.mrf.mxu2  ;;  %v1110_v21 = vsel %vm626_vm2, %v1102_v19, -inf }
 0x450   : > { %1111 = vmax.xlane.f32.xlu2 %v1110_v21 }
 0x455   : > { %v1097_v22 = vpop.f32.mrf.mxu0 }
 0x456   : > { %v1103_v1 = vsel %vm2550_vm1, %v1097_v22, -inf }
 0x457   : > { %v2701_v23 = vpop.f32.mrf.mxu2  ;;  %v1113_v24 = vsel %vm626_vm2, %v1103_v1, -inf }
 0x458   : > { %1114 = vmax.xlane.f32.xlu0 %v1113_v24 }
 0x45f   : > { %v2704_v25 = vpop.f32.mrf.mxu2 }
 0x467   : > { %v2706_v27 = vpop.f32.mrf.mxu2 }
 0x46c   : > { %2032 = vrot.lane.b32.xlu0 %v2521_v44, %s2276_s25  ;;  %v854_v44 = vsel %vm626_vm2, %v2660_v53, 0.0 }
 0x46f   : > { %v1298_v30 = vpop.f32.mrf.mxu2 }
 0x470   : > { %v1343_v31 = vsel %vm2546_vm15, %v1298_v30, -inf }
 0x471   : > { %v1347_v32 = vsel %vm626_vm2, %v1343_v31, -inf }
 0x472   : > { %1348 = vmax.xlane.f32.xlu1 %v1347_v32 }
 0x477   : > { %v1301_v35 = vpop.f32.mrf.mxu2 }
 0x478   : > { %v1344_v0 = vsel %vm2550_vm1, %v1301_v35, -inf }
 0x479   : > { %v1350_v36 = vsel %vm626_vm2, %v1344_v0, -inf }
 0x47a   : > { %852 = vadd.xlane.f32.xlu1 %v851_v28  ;;  %1351 = vmax.xlane.f32.xlu2 %v1350_v36 }
 0x482   : > { %855 = vadd.xlane.f32.xlu1 %v854_v44 }
 0x48a   : > { %858 = vadd.xlane.f32.xlu1 %v857_v37 }
 0x492   : > { %1129 = vadd.xlane.f32.xlu1 %v1128_v38 }
 0x496   : > { %849 = vadd.xlane.f32.xlu0 %v848_v2 }
 0x49d   : > { %v2725_v41 = vpop.f32.mrf.mxu3 }
 0x49e   : > { %1132 = vadd.xlane.f32.xlu0 %v1131_v29 }
 0x4a5   : > { %v2728_v39 = vpop.f32.mrf.mxu3 }
 0x4ad   : > { %v1337_v45 = vpop.f32.mrf.mxu3 }
 0x4ae   : > { %v2732_v46 = vsel %vm2546_vm15, %v1337_v45, -inf }
 0x4af   : > { %v1353_v47 = vsel %vm626_vm2, %v2732_v46, -inf }
 0x4b0   : > { %1354 = vmax.xlane.f32.xlu2 %v1353_v47 }
 0x4b5   : > { %v1340_v48 = vpop.f32.mrf.mxu3 }
 0x4b6   : > { %v2738_v6 = vsel %vm2550_vm1, %v1340_v48, -inf }
 0x4b7   : > { %v1356_v49 = vsel %vm626_vm2, %v2738_v6, -inf }
 0x4b8   : > { %1357 = vmax.xlane.f32.xlu2 %v1356_v49 }
 0x4c3   : > { %v1112_v50 = vpop.xlane.xlu2 %1111 }
 0x4c4   : > { %v1118_v51 = vsub.f32 %v1102_v19, %v1112_v50 }
 0x4c6   : > { %v1124_v52 = vmul.f32 1.442695, %v1118_v51 }
 0x4c8   : > { %2083 = vpow2.f32 %v1124_v52 }
 0x4cb   : > { %v1115_v4 = vpop.xlane.xlu0 %1114 }
 0x4cc   : > { %v1119_v53 = vsub.f32 %v1103_v1, %v1115_v4 }
 0x4ce   : > { %v2084_v54 = vpop.eup %2083  ;;  %v1126_v12 = vmul.f32 1.442695, %v1119_v53 }
 0x4cf   : > { %1886 = vmatmul.msk.f32.vlgmr.msrb.gmra.mxu0 %vm626_vm2, %v2084_v54  ;;  %v1134_v55 = vsel %vm626_vm2, %v2084_v54, 0.0  ;;  %v1905_v54 = vld [vmem:[%s2958_s6 + $0x18] sm:$0xff] }
 0x4d0   : > { %2085 = vpow2.f32 %v1126_v12  ;;  %1135 = vadd.xlane.f32.xlu0 %v1134_v55  ;;  %2037 = vrot.lane.b32.xlu2 %v2512_v43, %s2276_s25  ;;  %v1867_v43 = vld [vmem:[%s2958_s6 + $0x8] sm:$0xff] }
 0x4d1   : > { %967 = vmatpush.msra.mxu1 %v1867_v43  ;;  %1490 = vmatpush.msra.mxu3 %v1905_v54  ;;  %v1626_v54 = vld [vmem:[%s2959_s7 + $0x10] sm:$0xff] }
 0x4d3   : > { %1247 = vmatpush.msrb.mxu1 %v1888_v15 }
 0x4d6   : > { %v2086_v5 = vpop.eup %2085 }
 0x4d7   : > { %1887 = vmatmul.msk.f32.gmra.mxu0 %vm626_vm2, %v2086_v5  ;;  %v1137_v56 = vsel %vm626_vm2, %v2086_v5, 0.0 }
 0x4d8   : > { %1138 = vadd.xlane.f32.xlu0 %v1137_v56 }
 0x4de   : > { %v2033_v42 = vpop.permute.xlu0 %2032 }
 0x4df   : > { %v2034_v57 = vunpack.i.l.bf16 %v2033_v42  ;;  %v2035_v58 = vunpack.i.h.bf16 %v2033_v42 }
 0x4e1   : > { %1409 = vmatpush.msra.mxu0 %v2034_v57 }
 0x4e3   : > { %1410 = vmatpush.msra.mxu0 %v2035_v58 }
 0x4e5   : > { %v1349_v59 = vpop.xlane.xlu1 %1348 }
 0x4e6   : > { %v1359_v60 = vsub.f32 %v1343_v31, %v1349_v59 }
 0x4e8   : > { %v1363_v61 = vmul.f32 1.442695, %v1359_v60 }
 0x4ea   : > { %2087 = vpow2.f32 %v1363_v61 }
 0x4ed   : > { %v1352_v62 = vpop.xlane.xlu2 %1351  ;;  %v853_v11 = vpop.xlane.xlu1 %852 }
 0x4ee   : > { %v1360_v63 = vsub.f32 %v1344_v0, %v1352_v62 }
 0x4f0   : > { %v2088_v3 = vpop.eup %2087  ;;  %v1365_v7 = vmul.f32 1.442695, %v1360_v63 }
 0x4f1   : > { %1901 = vmatmul.msk.f32.vlgmr.msra.gmra.mxu0 %vm626_vm2, %v2088_v3  ;;  %v1371_v9 = vsel %vm626_vm2, %v2088_v3, 0.0 }
 0x4f2   : > { %2089 = vpow2.f32 %v1365_v7 }
 0x4f5   : > { %v856_v14 = vpop.xlane.xlu1 %855 }
 0x4f8   : > { %v2090_v8 = vpop.eup %2089 }
 0x4f9   : > { %1372 = vadd.xlane.f32.xlu2 %v1371_v9  ;;  %1902 = vmatmul.msk.f32.gmra.mxu0 %vm626_vm2, %v2090_v8  ;;  %v1374_v10 = vsel %vm626_vm2, %v2090_v8, 0.0 }
 0x4fa   : > { %1375 = vadd.xlane.f32.xlu1 %v1374_v10 }
 0x4fd   : > { %v859_v22 = vpop.xlane.xlu1 %858 }
 0x505   : > { %v1130_v31 = vpop.xlane.xlu1 %1129 }
 0x509   : > { %v850_v13 = vpop.xlane.xlu0 %849 }
 0x50a   : > { %2091 = vrcp.f32 %v850_v13 }
 0x50b   : > { %2093 = vrcp.f32 %v853_v11 }
 0x50c   : > { %2095 = vrcp.f32 %v856_v14 }
 0x50d   : > { %2097 = vrcp.f32 %v859_v22 }
 0x50e   : > { %2099 = vrcp.f32 %v1130_v31 }
 0x510   : > { %v2092_v40 = vpop.eup %2091 }
 0x511   : > { %v934_v18 = vmul.f32 %v2092_v40, %v2645_v33  ;;  %v2094_v19 = vpop.eup %2093  ;;  %v1133_v28 = vpop.xlane.xlu0 %1132 }
 0x512   : > { %v935_v21 = vmul.f32 %v2094_v19, %v2647_v34  ;;  %v2096_v1 = vpop.eup %2095 }
 0x513   : > { %1868 = vmatmul.msk.f32.vlgmr.msra.gmra.mxu1 %vm549_vm14, %v934_v18  ;;  %v936_v24 = vmul.f32 %v2096_v1, %v2690_v16  ;;  %v2098_v32 = vpop.eup %2097 }
 0x514   : > { %v937_v0 = vmul.f32 %v2098_v32, %v2692_v17  ;;  %v2100_v44 = vpop.eup %2099 }
 0x515   : > { %v1214_v2 = vmul.f32 %v2100_v44, %v2725_v41 }
 0x51b   : > { %1869 = vmatmul.msk.f32.gmra.mxu1 %vm549_vm14, %v935_v21  ;;  %v2127_v21 = vld [vmem:[%s2406_s24] sm:$0xff] }
 0x523   : > { %1870 = vmatmul.msk.f32.gmra.mxu1 %vm549_vm14, %v936_v24  ;;  %v1355_v30 = vpop.xlane.xlu2 %1354 }
 0x524   : > { %v1361_v33 = vsub.f32 %v2732_v46, %v1355_v30 }
 0x526   : > { %v1367_v35 = vmul.f32 1.442695, %v1361_v33 }
 0x528   : > { %2101 = vpow2.f32 %v1367_v35 }
 0x529   : > { %2103 = vrcp.f32 %v1133_v28 }
 0x52b   : > { %1871 = vmatmul.msk.f32.gmra.mxu1 %vm549_vm14, %v937_v0  ;;  %v1358_v34 = vpop.xlane.xlu2 %1357  ;;  %v2128_v0 = vld [vmem:[%s2406_s24 + $0x8] sm:$0xff] }
 0x52c   : > { %v1362_v36 = vsub.f32 %v2738_v6, %v1358_v34 }
 0x52e   : > { %v2102_v16 = vpop.eup %2101  ;;  %v1369_v37 = vmul.f32 1.442695, %v1362_v36 }
 0x52f   : > { %v1377_v38 = vsel %vm626_vm2, %v2102_v16, 0.0  ;;  %v2104_v45 = vpop.eup %2103 }
 0x530   : > { %2105 = vpow2.f32 %v1369_v37  ;;  %1378 = vadd.xlane.f32.xlu1 %v1377_v38  ;;  %v1215_v6 = vmul.f32 %v2104_v45, %v2728_v39 }
 0x533   : > { %1889 = vmatmul.msk.f32.vlgmr.msrb.gmra.mxu1 %vm549_vm14, %v1214_v2  ;;  %v2038_v29 = vpop.permute.xlu2 %2037 }
 0x534   : > { %v2039_v17 = vunpack.i.l.bf16 %v2038_v29  ;;  %v2040_v47 = vunpack.i.h.bf16 %v2038_v29  ;;  %v2129_v29 = vld [vmem:[%s2406_s24 + $0x10] sm:$0xff] }
 0x536   : > { %v2106_v46 = vpop.eup %2105  ;;  %1444 = vmatpush.msra.mxu2 %v2039_v17 }
 0x537   : > { %v1380_v48 = vsel %vm626_vm2, %v2106_v46, 0.0 }
 0x538   : > { %1381 = vadd.xlane.f32.xlu1 %v1380_v48  ;;  %1445 = vmatpush.msra.mxu2 %v2040_v47 }
 0x539   : > { %1903 = vmatmul.msk.f32.vlgmr.msra.gmra.mxu2 %vm626_vm2, %v2102_v16 }
 0x53b   : > { %1890 = vmatmul.msk.f32.gmra.mxu1 %vm549_vm14, %v1215_v6 }
 0x541   : > { %1904 = vmatmul.msk.f32.gmra.mxu2 %vm626_vm2, %v2106_v46 }
 0x543   : > { %v1136_v41 = vpop.xlane.xlu0 %1135 }
 0x544   : > { %2107 = vrcp.f32 %v1136_v41 }
 0x54a   : > { %v2108_v50 = vpop.eup %2107 }
 0x54b   : > { %v1139_v49 = vpop.xlane.xlu0 %1138 }
 0x54c   : > { %v1204_v51 = vpop.f32.mrf.mxu0  ;;  %2109 = vrcp.f32 %v1139_v49 }
 0x54d   : > { %v1216_v52 = vmul.f32 %v2108_v50, %v1204_v51  ;;  %v2130_v50 = vld [vmem:[%s2406_s24 + $0x18] sm:$0xff]  ;;  %s2207_s24 = scalar_lea.hbm %s2206_s13, 32 }
 0x54e   : > { %p2208_p0 = scmp.ne.s32.totalorder %s2206_s13, %s2207_s24  ;;  %p2213_p4 = scmp.lt.s32.totalorder %s2211_s29, %s2207_s24 }
 0x54f   : > { %1891 = vmatmul.msk.f32.gmra.mxu1 %vm549_vm14, %v1216_v52 }
 0x550   : > { %p2209_p1 = pnand %p2208_p0, %p2367_p5  ;;  %p2214_p7 = por %p2213_p4, %p2212_p3 }
 0x552   : > { %v2110_v4 = vpop.eup %2109  ;;  %p2210_p2 = pneg %p2209_p1 }
 0x554   : > { %v1207_v53 = vpop.f32.mrf.mxu0  ;;  %p2215_p8 = pnand %p2214_p7, %p2210_p2 }
 0x555   : > { %v1217_v39 = vmul.f32 %v2110_v4, %v1207_v53  ;;  %v1627_v53 = vld [vmem:[%s2959_s7 + $0x18] sm:$0xff] }
 0x556   : > { %1652 = vmatpush.msrb.mxu0 %v1627_v53 }
 0x557   : > { %1892 = vmatmul.msk.f32.gmra.mxu1 %vm549_vm14, %v1217_v39  ;;  %v1625_v39 = vld [vmem:[%s2959_s7 + $0x8] sm:$0xff] }
 0x558   : > { %1653 = vmatpush.msrb.mxu0 %v1626_v54 }
 0x55a   : > { %1654 = vmatpush.msrb.mxu0 %v1625_v39  ;;  %v1684_v39 = vld [vmem:[%s2960_s8 + $0x58] sm:$0xff] }
 0x56c   : > { %v1373_v12 = vpop.xlane.xlu2 %1372 }
 0x56d   : > { %2111 = vrcp.f32 %v1373_v12  ;;  %v1376_v5 = vpop.xlane.xlu1 %1375 }
 0x56e   : > { %v1412_v55 = vpop.f32.mrf.mxu0  ;;  %2113 = vrcp.f32 %v1376_v5 }
 0x573   : > { %v2112_v56 = vpop.eup %2111 }
 0x574   : > { %v1457_v42 = vmul.f32 %v2112_v56, %v1412_v55  ;;  %v2114_v58 = vpop.eup %2113  ;;  %v1624_v55 = vld [vmem:[%s2959_s7] sm:$0xff] }
 0x575   : > { %1655 = vmatpush.msrb.mxu0 %v1624_v55 }
 0x576   : > { %1906 = vmatmul.msk.f32.vlgmr.msra.gmra.mxu3 %vm549_vm14, %v1457_v42  ;;  %v1415_v57 = vpop.f32.mrf.mxu0 }
 0x577   : > { %v1458_v59 = vmul.f32 %v2114_v58, %v1415_v57 }
 0x57e   : > { %1907 = vmatmul.msk.f32.gmra.mxu3 %vm549_vm14, %v1458_v59 }
 0x590   : > { %v969_v9 = vpop.f32.mrf.mxu1 }
 0x591   : > { %v1011_v14 = vadd.f32 %v2696_v20, %v969_v9 }
 0x598   : > { %v972_v10 = vpop.f32.mrf.mxu1 }
 0x599   : > { %v1014_v24 = vadd.f32 %v2701_v23, %v972_v10 }
 0x5a0   : > { %v975_v11 = vpop.f32.mrf.mxu1 }
 0x5a1   : > { %v1017_v16 = vadd.f32 %v2704_v25, %v975_v11 }
 0x5a3   : > { %v1379_v60 = vpop.xlane.xlu1 %1378 }
 0x5a4   : > { %2115 = vrcp.f32 %v1379_v60 }
 0x5a8   : > { %v978_v13 = vpop.f32.mrf.mxu1 }
 0x5a9   : > { %v1020_v46 = vadd.f32 %v2706_v27, %v978_v13 }
 0x5aa   : > { %v2116_v62 = vpop.eup %2115 }
 0x5ab   : > { %v1382_v61 = vpop.xlane.xlu1 %1381 }
 0x5ac   : > { %2117 = vrcp.f32 %v1382_v61 }
 0x5b0   : > { %v1249_v40 = vpop.f32.mrf.mxu1 }
 0x5b1   : > { %v1261_v15 = vadd.f32 %v1249_v40, %v1011_v14 }
 0x5b2   : > { %v2118_v7 = vpop.eup %2117 }
 0x5b8   : > { %v1252_v1 = vpop.f32.mrf.mxu1 }
 0x5b9   : > { %v1262_v33 = vadd.f32 %v1252_v1, %v1014_v24 }
 0x5bc   : > { %v1447_v63 = vpop.f32.mrf.mxu2 }
 0x5bd   : > { %v1459_v3 = vmul.f32 %v2116_v62, %v1447_v63 }
 0x5bf   : > { %1908 = vmatmul.msk.f32.gmra.mxu3 %vm549_vm14, %v1459_v3 }
 0x5c4   : > { %v1450_v43 = vpop.f32.mrf.mxu2 }
 0x5c5   : > { %v1460_v8 = vmul.f32 %v2118_v7, %v1450_v43 }
 0x5c7   : > { %1909 = vmatmul.msk.f32.gmra.mxu3 %vm549_vm14, %v1460_v8 }
 0x5cc   : > { %v1255_v44 = vpop.f32.mrf.mxu1 }
 0x5cd   : > { %v1263_v37 = vadd.f32 %v1255_v44, %v1017_v16 }
 0x5d4   : > { %v1258_v45 = vpop.f32.mrf.mxu1 }
 0x5d5   : > { %v1264_v6 = vadd.f32 %v1258_v45, %v1020_v46 }
 0x5f9   : > { %v1492_v18 = vpop.f32.mrf.mxu3 }
 0x5fa   : > { %v1504_v19 = vadd.f32 %v1492_v18, %v1261_v15 }
 0x5fc   : > { %v2787_v22 = vadd.f32 %v2127_v21, %v1504_v19  ;;  %v2838_v19 = vld [vmem:[#allocation5] ss:$0 sm:$0xff] }
 0x5fe   : > { %v1514_v30 = vsel %vm373_vm0, %v2787_v22, 0.0  ;;  %v1530_v31 = vmul.f32 %v2787_v22, %v2787_v22 }
 0x5ff   : > { %1515 = vadd.xlane.f32.xlu1 %v1514_v30  ;;  %v2843_v30 = vld [vmem:[%s2956_s4] ss:$0 sm:$0xff] }
 0x600   : > { %v1534_v20 = vsel %vm373_vm0, %v1530_v31, 0.0 }
 0x601   : > { %1535 = vadd.xlane.f32.xlu2 %v1534_v20  ;;  %v1495_v32 = vpop.f32.mrf.mxu3 }
 0x602   : > { %v1505_v35 = vadd.f32 %v1495_v32, %v1262_v33 }
 0x604   : > { %v2796_v34 = vadd.f32 %v2128_v0, %v1505_v35 }
 0x606   : > { %v1517_v23 = vsel %vm373_vm0, %v2796_v34, 0.0  ;;  %v1531_v28 = vmul.f32 %v2796_v34, %v2796_v34 }
 0x607   : > { %1518 = vadd.xlane.f32.xlu0 %v1517_v23 }
 0x608   : > { %v1537_v36 = vsel %vm373_vm0, %v1531_v28, 0.0 }
 0x609   : > { %1538 = vadd.xlane.f32.xlu1 %v1537_v36 }
 0x642   : > { %v1498_v38 = vpop.f32.mrf.mxu3 }
 0x643   : > { %v1506_v2 = vadd.f32 %v1498_v38, %v1263_v37 }
 0x645   : > { %v2805_v17 = vadd.f32 %v2129_v29, %v1506_v2 }
 0x647   : > { %v1520_v47 = vsel %vm373_vm0, %v2805_v17, 0.0  ;;  %v1532_v48 = vmul.f32 %v2805_v17, %v2805_v17 }
 0x648   : > { %1521 = vadd.xlane.f32.xlu2 %v1520_v47 }
 0x649   : > { %v1540_v25 = vsel %vm373_vm0, %v1532_v48, 0.0 }
 0x64a   : > { %1541 = vadd.xlane.f32.xlu0 %v1540_v25  ;;  %v1501_v41 = vpop.f32.mrf.mxu3  ;;  %v1687_v25 = vld [vmem:[%s2960_s8 + $0x70] sm:$0xff] }
 0x64b   : > { %v1507_v49 = vadd.f32 %v1501_v41, %v1264_v6  ;;  %v1688_v6 = vld [vmem:[%s2960_s8 + $0x78] sm:$0xff] }
 0x64c   : > { %1689 = vmatpush.msra.mxu1 %v1688_v6 }
 0x64d   : > { %v2814_v51 = vadd.f32 %v2130_v50, %v1507_v49 }
 0x64e   : > { %1690 = vmatpush.msra.mxu1 %v1687_v25 }
 0x64f   : > { %v1523_v52 = vsel %vm373_vm0, %v2814_v51, 0.0  ;;  %v1533_v27 = vmul.f32 %v2814_v51, %v2814_v51 }
 0x650   : > { %1524 = vadd.xlane.f32.xlu1 %v1523_v52  ;;  %v1686_v52 = vld [vmem:[%s2960_s8 + $0x68] sm:$0xff] }
 0x651   : > { %v1543_v4 = vsel %vm373_vm0, %v1533_v27, 0.0  ;;  %1691 = vmatpush.msra.mxu1 %v1686_v52 }
 0x652   : > { %1544 = vadd.xlane.f32.xlu2 %v1543_v4  ;;  %v1685_v4 = vld [vmem:[%s2960_s8 + $0x60] sm:$0xff] }
 0x653   : > { %1692 = vmatpush.msra.mxu1 %v1685_v4 }
 0x655   : > { %1693 = vmatpush.msra.mxu1 %v1684_v39 }
 0x672   : > { %v1516_v12 = vpop.xlane.xlu1 %1515 }
 0x673   : > { %v1526_v5 = vmul.f32 %v1516_v12, %v2443_v26 }
 0x674   : > { %v1536_v56 = vpop.xlane.xlu2 %1535 }
 0x675   : > { %v1550_v42 = vmul.f32 %v1526_v5, %v1526_v5  ;;  %v1546_v57 = vmul.f32 %v1536_v56, %v2443_v26  ;;  %v1558_v18 = vsub.f32 %v2787_v22, %v1526_v5  ;;  %v1682_v5 = vld [vmem:[%s2960_s8 + $0x48] sm:$0xff] }
 0x677   : > { %v1554_v58 = vsub.f32 %v1546_v57, %v1550_v42  ;;  %v1681_v42 = vld [vmem:[%s2960_s8 + $0x40] sm:$0xff] }
 0x679   : > { %v1562_v59 = vadd.f32 1e-05, %v1554_v58 }
 0x67a   : > { %v1519_v60 = vpop.xlane.xlu0 %1518 }
 0x67b   : > { %2119 = vrsqrt.f32 %v1562_v59  ;;  %v1527_v61 = vmul.f32 %v1519_v60, %v2443_v26  ;;  %vm1572_vm4 = vweird.f32 %v1562_v59 }
 0x67c   : > { %v1539_v62 = vpop.xlane.xlu1 %1538 }
 0x67d   : > { %v1551_v63 = vmul.f32 %v1527_v61, %v1527_v61  ;;  %v1547_v3 = vmul.f32 %v1539_v62, %v2443_v26  ;;  %v1559_v0 = vsub.f32 %v2796_v34, %v1527_v61 }
 0x67f   : > { %v1555_v7 = vsub.f32 %v1547_v3, %v1551_v63  ;;  %v1679_v63 = vld [vmem:[%s2960_s8 + $0x30] sm:$0xff] }
 0x681   : > { %v2120_v43 = vpop.eup %2119  ;;  %v1563_v8 = vadd.f32 1e-05, %v1555_v7 }
 0x682   : > { %v1567_v9 = vmul.f32 %v2120_v43, %v1562_v59  ;;  %vm1573_vm3 = vweird.f32 %v2120_v43  ;;  %v1680_v59 = vld [vmem:[%s2960_s8 + $0x38] sm:$0xff] }
 0x683   : > { %2121 = vrsqrt.f32 %v1563_v8  ;;  %vm1574_vm5 = vmor %vm1572_vm4, %vm1573_vm3  ;;  %vm1582_vm7 = vweird.f32 %v1563_v8 }
 0x684   : > { %v1568_v10 = vmul.f32 %v2120_v43, %v1567_v9 }
 0x686   : > { %v1569_v11 = vmul.f32 0.5, %v1568_v10 }
 0x688   : > { %v1570_v13 = vsub.f32 1.5, %v1569_v11  ;;  %v1677_v11 = vld [vmem:[%s2960_s8 + $0x20] sm:$0xff] }
 0x689   : > { %v2122_v40 = vpop.eup %2121 }
 0x68a   : > { %v1571_v14 = vmul.f32 %v2120_v43, %v1570_v13  ;;  %v1577_v15 = vmul.f32 %v2122_v40, %v1563_v8  ;;  %vm1583_vm6 = vweird.f32 %v2122_v40  ;;  %v1678_v8 = vld [vmem:[%s2960_s8 + $0x28] sm:$0xff] }
 0x68b   : > { %vm1584_vm8 = vmor %vm1582_vm7, %vm1583_vm6 }
 0x68c   : > { %v1575_v21 = vsel %vm1574_vm5, %v2120_v43, %v1571_v14  ;;  %v1578_v1 = vmul.f32 %v2122_v40, %v1577_v15  ;;  %v1676_v14 = vld [vmem:[%s2960_s8 + $0x18] sm:$0xff] }
 0x68d   : > { %v1606_v24 = vmul.f32 %v1575_v21, %v1558_v18  ;;  %v1675_v21 = vld [vmem:[%s2960_s8 + $0x10] sm:$0xff] }
 0x68e   : > { %v1579_v31 = vmul.f32 0.5, %v1578_v1 }
 0x68f   : > { %v1613_v33 = vmul.f32 %v2838_v19, %v1606_v24 }
 0x690   : > { %v1580_v20 = vsub.f32 1.5, %v1579_v31 }
 0x691   : > { %v1620_v32 = vadd.f32 %v2843_v30, %v1613_v33 }
 0x692   : > { %v1581_v35 = vmul.f32 %v2122_v40, %v1580_v20  ;;  %v1674_v20 = vld [vmem:[%s2960_s8 + $0x8] sm:$0xff] }
 0x693   : > { %1910 = vmatmul.msk.f32.vlgmr.msrb.gmra.mxu0 %vm373_vm0, %v1620_v32  ;;  %v1673_v32 = vld [vmem:[%s2960_s8] sm:$0xff] }
 0x694   : > { %v1585_v23 = vsel %vm1584_vm8, %v2122_v40, %v1581_v35 }
 0x695   : > { %v1607_v28 = vmul.f32 %v1585_v23, %v1559_v0 }
 0x697   : > { %v1614_v36 = vmul.f32 %v2838_v19, %v1607_v28 }
 0x699   : > { %v1621_v44 = vadd.f32 %v2843_v30, %v1614_v36 }
 0x69b   : > { %1911 = vmatmul.msk.f32.gmra.mxu0 %vm373_vm0, %v1621_v44 }
 0x6bb   : > { %v1522_v16 = vpop.xlane.xlu2 %1521 }
 0x6bc   : > { %v1528_v37 = vmul.f32 %v1522_v16, %v2443_v26 }
 0x6bd   : > { %v1542_v38 = vpop.xlane.xlu0 %1541 }
 0x6be   : > { %v1552_v2 = vmul.f32 %v1528_v37, %v1528_v37  ;;  %v1548_v29 = vmul.f32 %v1542_v38, %v2443_v26  ;;  %v1560_v62 = vsub.f32 %v2805_v17, %v1528_v37 }
 0x6c0   : > { %v1556_v45 = vsub.f32 %v1548_v29, %v1552_v2 }
 0x6c2   : > { %v1564_v46 = vadd.f32 1e-05, %v1556_v45 }
 0x6c3   : > { %v1525_v47 = vpop.xlane.xlu1 %1524 }
 0x6c4   : > { %2123 = vrsqrt.f32 %v1564_v46  ;;  %v1529_v48 = vmul.f32 %v1525_v47, %v2443_v26  ;;  %vm1592_vm10 = vweird.f32 %v1564_v46 }
 0x6c5   : > { %v1545_v41 = vpop.xlane.xlu2 %1544 }
 0x6c6   : > { %v1553_v49 = vmul.f32 %v1529_v48, %v1529_v48  ;;  %v1549_v50 = vmul.f32 %v1545_v41, %v2443_v26  ;;  %v1683_v26 = vld [vmem:[%s2960_s8 + $0x50] sm:$0xff]  ;;  %v1561_v18 = vsub.f32 %v2814_v51, %v1529_v48 }
 0x6c7   : > { %1694 = vmatpush.msra.mxu1 %v1683_v26 }
 0x6c8   : > { %v1557_v27 = vsub.f32 %v1549_v50, %v1553_v49 }
 0x6c9   : > { %1695 = vmatpush.msra.mxu1 %v1682_v5 }
 0x6ca   : > { %v2124_v53 = vpop.eup %2123  ;;  %v1565_v54 = vadd.f32 1e-05, %v1557_v27 }
 0x6cb   : > { %v1587_v12 = vmul.f32 %v2124_v53, %v1564_v46  ;;  %vm1593_vm9 = vweird.f32 %v2124_v53  ;;  %1696 = vmatpush.msra.mxu1 %v1681_v42 }
 0x6cc   : > { %2125 = vrsqrt.f32 %v1565_v54  ;;  %vm1594_vm11 = vmor %vm1592_vm10, %vm1593_vm9  ;;  %vm1602_vm13 = vweird.f32 %v1565_v54 }
 0x6cd   : > { %v1588_v55 = vmul.f32 %v2124_v53, %v1587_v12  ;;  %1697 = vmatpush.msra.mxu1 %v1680_v59 }
 0x6cf   : > { %v1589_v56 = vmul.f32 0.5, %v1588_v55  ;;  %1698 = vmatpush.msra.mxu1 %v1679_v63 }
 0x6d1   : > { %v1590_v57 = vsub.f32 1.5, %v1589_v56  ;;  %1699 = vmatpush.msra.mxu1 %v1678_v8 }
 0x6d2   : > { %v2126_v58 = vpop.eup %2125 }
 0x6d3   : > { %v1591_v60 = vmul.f32 %v2124_v53, %v1590_v57  ;;  %v1597_v61 = vmul.f32 %v2126_v58, %v1565_v54  ;;  %vm1603_vm12 = vweird.f32 %v2126_v58  ;;  %1700 = vmatpush.msra.mxu1 %v1677_v11 }
 0x6d4   : > { %vm1604_vm14 = vmor %vm1602_vm13, %vm1603_vm12 }
 0x6d5   : > { %v1598_v3 = vmul.f32 %v2126_v58, %v1597_v61  ;;  %v1595_v7 = vsel %vm1594_vm11, %v2124_v53, %v1591_v60  ;;  %1701 = vmatpush.msra.mxu1 %v1676_v14 }
 0x6d6   : > { %v1608_v43 = vmul.f32 %v1595_v7, %v1560_v62 }
 0x6d7   : > { %v1599_v9 = vmul.f32 0.5, %v1598_v3  ;;  %1702 = vmatpush.msra.mxu1 %v1675_v21 }
 0x6d8   : > { %v1615_v10 = vmul.f32 %v2838_v19, %v1608_v43 }
 0x6d9   : > { %v1600_v13 = vsub.f32 1.5, %v1599_v9  ;;  %1703 = vmatpush.msra.mxu1 %v1674_v20 }
 0x6da   : > { %v1622_v40 = vadd.f32 %v2843_v30, %v1615_v10 }
 0x6db   : > { %v1601_v15 = vmul.f32 %v2126_v58, %v1600_v13  ;;  %1704 = vmatpush.msra.mxu1 %v1673_v32 }
 0x6dc   : > { %1912 = vmatmul.msk.f32.gmra.mxu0 %vm373_vm0, %v1622_v40 }
 0x6dd   : > { %v1605_v1 = vsel %vm1604_vm14, %v2126_v58, %v1601_v15 }
 0x6de   : > { %v1609_v24 = vmul.f32 %v1605_v1, %v1561_v18 }
 0x6e0   : > { %v1616_v31 = vmul.f32 %v2838_v19, %v1609_v24 }
 0x6e2   : > { %v1623_v33 = vadd.f32 %v2843_v30, %v1616_v31 }
 0x6e4   : > { %1913 = vmatmul.msk.f32.gmra.mxu0 %vm373_vm0, %v1623_v33 }
 0x710   : > { %v1657_v35 = vpop.f32.mrf.mxu0 }
 0x711   : > { %v1669_v0 = vmax.f32 %v1657_v35, 0.0 }
 0x713   : > { %1705 = vmatmul.f32.vlgmr.msra.gmra.mxu1 %v1669_v0 }
 0x718   : > { %v1660_v23 = vpop.f32.mrf.mxu0 }
 0x719   : > { %v1670_v19 = vmax.f32 %v1660_v23, 0.0 }
 0x71b   : > { %1708 = vmatmul.f32.gmra.mxu1 %v1670_v19 }
 0x759   : > { %v1663_v30 = vpop.f32.mrf.mxu0 }
 0x75a   : > { %v1671_v28 = vmax.f32 %v1663_v30, 0.0 }
 0x75c   : > { %1711 = vmatmul.f32.gmra.mxu1 %v1671_v28 }
 0x761   : > { %v1666_v36 = vpop.f32.mrf.mxu0 }
 0x762   : > { %v1672_v44 = vmax.f32 %v1666_v36, 0.0 }
 0x764   : > { %1714 = vmatmul.f32.gmra.mxu1 %v1672_v44 }
 0x790   : > { %v1706_v16 = vpop.f32.mrf.mxu1 }
 0x791   : > { %v1718_v37 = vadd.f32 %v1706_v16, %v2787_v22 }
 0x793   : > { %1722 = vst.msk [vmem:[%s358_s28] sm:$0xff] %vm373_vm0, %v1718_v37 }
 0x798   : > { %v1709_v38 = vpop.f32.mrf.mxu1 }
 0x799   : > { %v1719_v2 = vadd.f32 %v1709_v38, %v2796_v34 }
 0x79b   : > { %1723 = vst.msk [vmem:[%s358_s28 + $0x8] sm:$0xff] %vm373_vm0, %v1719_v2 }
 0x7d9   : > { %v1712_v29 = vpop.f32.mrf.mxu1 }
 0x7da   : > { %v1720_v45 = vadd.f32 %v1712_v29, %v2805_v17 }
 0x7dc   : > { %1724 = vst.msk [vmem:[%s358_s28 + $0x10] sm:$0xff] %vm373_vm0, %v1720_v45 }
 0x7e1   : > { %v1715_v22 = vpop.f32.mrf.mxu1 }
 0x7e2   : > { %v1721_v46 = vadd.f32 %v1715_v22, %v2814_v51 }
 0x7e4   : > { %1725 = vst.msk [vmem:[%s358_s28 + $0x18] sm:$0xff] %vm373_vm0, %v1721_v46 }
 0x7e5   : > { %2218 = shalt.err (!%p2215_p8)
}
 0x7e6   : > { %s2277_s26 = smov 128   ;;  %s2278_s28 = smov 8  }
 0x7e7   : > { %1935 = dma.vmem_to_hbm [thread:$0]  (%p2367_p5), %s1741_s22, 512, %s1743_s21, %s1727_s23, %s2277_s26, %s2277_s26, %s2278_s28  }
 0x7e8 PF: > { %p1952_p9 = scmp.ge.s32.totalorder %s2261_s12, 2  ;;  %s1757_s17 = sand.u32 1, %s2249_s30  }
 0x7e9   : > { %s1758_s25 = scalar_lea.sflag [#allocation4], %s1757_s17 }
 0x7ea   : > { %p1945_p10 = pnand %p1952_p9, %p2371_p6 }
 0x7ec   : > { %p1946_p11 = pneg %p1945_p10 }
 0x7ee   : > { %2244 = dma.done.wait (%p1946_p11), %s1758_s25, 512  }
 0x7ef   : > { %2246 = vsyncadd (%p1946_p11), %s1758_s25, 4294966784  ;;  %p21_p12 = scmp.ge.s32.totalorder %s2354_s15, 4   ;;  %s2971_s30 = smov %s2253_s10 }
 0x7f0   : > { %s2972_s10 = smov %s2257_s11  ;;  %s2973_s11 = smov %s2365_s18 }
 0x7f1   : > { %s2974_s12 = smov %s2354_s15  ;;  %23 = sbr.rel (!%p21_p12) target bundleno = 5 (0x5), region = 103 }
 0x7f6   :  { %1764 = vsyncpa [#allocation3], 1 }
 0x7f7   :  { %1766 = vsyncpa [#allocation3 + $0x1], 1 }
 0x7f8   :  { %1767 = vsyncpa [#allocation6], 1 }
 0x7f9   :  { %1768 = vsyncpa [#allocation4], 1 }
 0x7fa   :  { %1770 = vsyncpa [#allocation4 + $0x1], 1 }

</bundles_post_ra>
